<compile_context>
chip_gen: v5e
topology: v5e:2x2
jax: 0.10.0
libtpu: 0.0.40
codegen_flags: <defaults>
</compile_context>

<pallas_src>
import math

import jax
import jax.numpy as jnp
from jax.experimental import pallas as pl
from jax.experimental.pallas import tpu as pltpu


PRIOR_MU = 0.0
PRIOR_SIGMA = 1.0


def _softplus(x):
    # Numerically-stable log(1 + exp(x)); identical math to torch.log(1 + torch.exp(rho)).
    return jnp.maximum(x, 0.0) + jnp.log1p(jnp.exp(-jnp.abs(x)))


# ----------------------------------------------------------------------------------------
# Forward kernel (hot path, no KL)
# ----------------------------------------------------------------------------------------
def _sample_and_apply(h, w_pack, b_pack, *, relu):
    """One BayesLinear_Normalq layer.
    w_pack = [mu, rho, eps] with shape (3, d_in, d_out); b_pack = [mu, rho, eps] (3, 1, d_out)."""
    w = w_pack[0] + w_pack[2] * _softplus(w_pack[1])
    b = b_pack[0] + b_pack[2] * _softplus(b_pack[1])
    # MXU hot path: bf16 operands, f32 accumulation.
    y = jnp.dot(h.astype(jnp.bfloat16), w.astype(jnp.bfloat16),
                preferred_element_type=jnp.float32) + b
    if relu:
        y = jnp.maximum(y, 0.0)
    return y


def _forward_kernel(x_ref, iw_ref, ib_ref, hw_ref, hb_ref, lw_ref, lb_ref,
                    out_ref, h_ref, res_ref):
    """Grid = (batch_tiles [parallel], 2*n_blocks [arbitrary]).
    h_ref / res_ref are VMEM scratch carrying the activation / block residual across the
    layer axis; hw/hb blocks stream one hidden layer per grid step (double-buffered)."""
    l = pl.program_id(1)
    n_hidden = pl.num_programs(1)

    # Layer step 0 of every batch tile: input layer + activation.
    @pl.when(l == 0)
    def _():
        h_ref[...] = _sample_and_apply(x_ref[...], iw_ref[...], ib_ref[...], relu=True)

    # First sub-layer of a residual block: stash the block input.
    @pl.when(l % 2 == 0)
    def _():
        res_ref[...] = h_ref[...]

    # Hidden (residual-block) layer l.
    y = _sample_and_apply(h_ref[...], hw_ref[0], hb_ref[0], relu=False)

    @pl.when(l % 2 == 0)
    def _():
        h_ref[...] = jnp.maximum(y, 0.0)

    @pl.when(l % 2 == 1)
    def _():
        # relu(layer2(.) + res); the model's extra outer activation is ReLU-idempotent.
        h_ref[...] = jnp.maximum(y + res_ref[...], 0.0)

    # Last layer (no activation) once the final block is done.
    @pl.when(l == n_hidden - 1)
    def _():
        out = _sample_and_apply(h_ref[...], lw_ref[...], lb_ref[...], relu=False)
        out_ref[...] = out.astype(out_ref.dtype)


# ----------------------------------------------------------------------------------------
# KL kernel (runs once per parameter update; independent of x and eps)
# ----------------------------------------------------------------------------------------
def _make_kl_sum(prior_mu, prior_sigma):
    prior_var = float(prior_sigma) ** 2
    inv_prior_var = 1.0 / prior_var
    log_prior_var = math.log(prior_var)

    def kl_sum(mu, rho):
        # KL( N(mu, std^2) || N(prior_mu, prior_var) ), closed form, summed over elements.
        # (get_kl_Gaussian_divergence source not provided; standard closed form used.)
        std = _softplus(rho)
        var = std * std
        log_std = jnp.log(jnp.maximum(std, 1e-20))
        if prior_mu == 0.0:
            quad = var + mu * mu
        else:
            quad = var + (mu - prior_mu) ** 2
        if prior_var != 1.0:
            quad = quad * inv_prior_var
        elem = quad - 2.0 * log_std - 1.0
        if log_prior_var != 0.0:
            elem = elem + log_prior_var
        return 0.5 * jnp.sum(elem)

    return kl_sum


def _make_kl_kernel(prior_mu, prior_sigma):
    kl_sum = _make_kl_sum(prior_mu, prior_sigma)

    def kernel(iw_ref, ib_ref, hw_ref, hb_ref, lw_ref, lb_ref, kl_ref):
        # Packs hold [mu, rho] only (no eps is shipped to this kernel).
        total = kl_sum(iw_ref[0], iw_ref[1]) + kl_sum(ib_ref[0], ib_ref[1])
        hw = hw_ref[...]        # (L, 2, d, d)
        hb = hb_ref[...]        # (L, 2, 1, d)
        total = total + kl_sum(hw[:, 0], hw[:, 1]) + kl_sum(hb[:, 0], hb[:, 1])
        total = total + kl_sum(lw_ref[0], lw_ref[1]) + kl_sum(lb_ref[0], lb_ref[1])
        kl_ref[...] = jnp.reshape(total, (1, 1))

    return kernel


# ----------------------------------------------------------------------------------------
# Wrappers
# ----------------------------------------------------------------------------------------
def _iter_layers(params):
    yield params["input"]
    for (p1, p2) in params["blocks"]:
        yield p1
        yield p2
    yield params["last"]


def sample_eps(key, params):
    """Fresh standard-normal reparameterisation noise per layer (torch's .normal_())."""
    eps = []
    for (wmu, _wrho, bmu, _brho) in _iter_layers(params):
        key, kw, kb = jax.random.split(key, 3)
        eps.append((jax.random.normal(kw, wmu.shape, wmu.dtype),
                    jax.random.normal(kb, bmu.shape, bmu.dtype)))
    return eps


def bbp_model_res_forward(params, eps, x, *, batch_tile=128):
    """Forward pass of BBP_Model_res (sample=True path, activation=ReLU) as one kernel."""
    n_blocks = len(params["blocks"])
    if n_blocks < 1:
        raise ValueError("layer-grid kernel assumes at least one residual block")
    layers = list(_iter_layers(params))
    eps = list(eps)
    B, d_in = x.shape
    d_h = params["input"][0].shape[1]
    d_out = params["last"][0].shape[1]
    n_hidden = 2 * n_blocks

    tb = min(batch_tile, B)
    assert B % tb == 0, "demo wrapper assumes batch divisible by the batch tile"
    # TODO(synk): pad the batch to a multiple of the tile for production use.

    # Pack mu/rho/eps into a few large lane-dense slabs (in training these would simply be
    # the stored parameter layout; stacking here is a one-off wrapper-side copy).
    def pack(layer, e):
        (wmu, wrho, bmu, brho), (weps, beps) = layer, e
        return jnp.stack([wmu, wrho, weps]), jnp.stack([bmu, brho, beps])

    iw, ib = pack(layers[0], eps[0])                       # (3, d_in, d_h), (3, 1, d_h)
    lw, lb = pack(layers[-1], eps[-1])                     # (3, d_h, d_out), (3, 1, d_out)
    hidden = [pack(l, e) for l, e in zip(layers[1:-1], eps[1:-1])]
    hw = jnp.stack([w for w, _ in hidden])                 # (L, 3, d_h, d_h)
    hb = jnp.stack([b for _, b in hidden])                 # (L, 3, 1, d_h)

    # VMEM budget: double-buffered per-step blocks + persistent scratch, with headroom.
    f32 = 4
    resident = (2 * (tb * d_in + tb * d_out + iw.size + ib.size + lw.size + lb.size
                     + 3 * d_h * d_h + 3 * d_h) + 2 * tb * d_h) * f32
    vmem_limit = int(min(max(4 * resident, 8 * 1024 * 1024), 120 * 1024 * 1024))

    grid = (B // tb, n_hidden)
    out = pl.pallas_call(
        _forward_kernel,
        grid=grid,
        in_specs=[
            pl.BlockSpec((tb, d_in), lambda b, l: (b, 0)),
            pl.BlockSpec((3, d_in, d_h), lambda b, l: (0, 0, 0)),
            pl.BlockSpec((3, 1, d_h), lambda b, l: (0, 0, 0)),
            pl.BlockSpec((1, 3, d_h, d_h), lambda b, l: (l, 0, 0, 0)),
            pl.BlockSpec((1, 3, 1, d_h), lambda b, l: (l, 0, 0, 0)),
            pl.BlockSpec((3, d_h, d_out), lambda b, l: (0, 0, 0)),
            pl.BlockSpec((3, 1, d_out), lambda b, l: (0, 0, 0)),
        ],
        out_specs=pl.BlockSpec((tb, d_out), lambda b, l: (b, 0)),
        out_shape=jax.ShapeDtypeStruct((B, d_out), jnp.float32),
        scratch_shapes=[pltpu.VMEM((tb, d_h), jnp.float32),   # h (activation carry)
                        pltpu.VMEM((tb, d_h), jnp.float32)],  # res (block input)
        compiler_params=pltpu.CompilerParams(
            dimension_semantics=("parallel", "arbitrary"),
            vmem_limit_bytes=vmem_limit),
    )(x, iw, ib, hw, hb, lw, lb)
    return out


def bbp_model_res_kl(params, *, prior_mu=PRIOR_MU, prior_sigma=PRIOR_SIGMA):
    """Total KL of all Bayesian layers (depends only on mu/rho -> call once per update)."""
    layers = list(_iter_layers(params))

    def pack2(layer):
        wmu, wrho, bmu, brho = layer
        return jnp.stack([wmu, wrho]), jnp.stack([bmu, brho])

    iw, ib = pack2(layers[0])
    lw, lb = pack2(layers[-1])
    hidden = [pack2(l) for l in layers[1:-1]]
    hw = jnp.stack([w for w, _ in hidden])
    hb = jnp.stack([b for _, b in hidden])

    vmem = pl.BlockSpec(memory_space=pltpu.MemorySpace.VMEM)
    kl = pl.pallas_call(
        _make_kl_kernel(prior_mu, prior_sigma),
        in_specs=[vmem] * 6,
        out_specs=pl.BlockSpec(memory_space=pltpu.MemorySpace.VMEM),
        out_shape=jax.ShapeDtypeStruct((1, 1), jnp.float32),
    )(iw, ib, hw, hb, lw, lb)
    # TODO(synk): tile this over layers for production hidden sizes (fully resident is fine
    # at demo sizes and this runs once per parameter update, not per MC sample).
    return kl[0, 0]


def bbp_model_res(params, eps, x):
    """Mirrors BBP_Model_res.forward: returns (output, KL_total)."""
    return bbp_model_res_forward(params, eps, x), bbp_model_res_kl(params)


# ----------------------------------------------------------------------------------------
# Init + pure-JAX references (for validation)
# ----------------------------------------------------------------------------------------
def init_layer_params(key, d_in, d_out):
    """Deterministic init matching the PyTorch __init__ ranges."""
    k1, k2, k3, k4 = jax.random.split(key, 4)
    wmu = jax.random.uniform(k1, (d_in, d_out), jnp.float32, -0.05, 0.05)
    wrho = jax.random.uniform(k2, (d_in, d_out), jnp.float32, -3.0, -2.0)
    bmu = jax.random.uniform(k3, (1, d_out), jnp.float32, -0.05, 0.05)
    brho = jax.random.uniform(k4, (1, d_out), jnp.float32, -3.0, -2.0)
    return (wmu, wrho, bmu, brho)


def init_model_params(key, layers):
    """layers = [d0, d1, ..., dL]: input_layer, res blocks for i in [1, L-2), last_layer."""
    n_layer = len(layers)
    keys = jax.random.split(key, 2 + 2 * max(0, n_layer - 3))
    params = {
        "input": init_layer_params(keys[0], layers[0], layers[1]),
        "last": init_layer_params(keys[1], layers[n_layer - 2], layers[n_layer - 1]),
        "blocks": [],
    }
    ki = 2
    for i in range(1, n_layer - 2):
        p1 = init_layer_params(keys[ki], layers[i], layers[i + 1]); ki += 1
        p2 = init_layer_params(keys[ki], layers[i], layers[i + 1]); ki += 1
        params["blocks"].append((p1, p2))
    return params


def forward_reference(params, eps, x, *, mimic_bf16=True):
    """Pure-JAX forward mirroring the torch graph (ReLU activation), same eps as kernel."""
    def lin(h, layer, e):
        wmu, wrho, bmu, brho = layer
        weps, beps = e
        w = wmu + weps * _softplus(wrho)
        b = bmu + beps * _softplus(brho)
        if mimic_bf16:
            return jnp.dot(h.astype(jnp.bfloat16), w.astype(jnp.bfloat16),
                           preferred_element_type=jnp.float32) + b
        return h @ w + b

    layers = list(_iter_layers(params))
    eps = list(eps)
    h = jnp.maximum(lin(x, layers[0], eps[0]), 0.0)
    idx = 1
    for _ in params["blocks"]:
        res = h
        h = jnp.maximum(lin(h, layers[idx], eps[idx]), 0.0)
        h = jnp.maximum(lin(h, layers[idx + 1], eps[idx + 1]) + res, 0.0)
        h = jnp.maximum(h, 0.0)   # the model's extra outer activation (ReLU-idempotent)
        idx += 2
    return lin(h, layers[-1], eps[-1])


def kl_reference(params, prior_mu=PRIOR_MU, prior_sigma=PRIOR_SIGMA):
    """Pure-JAX closed-form KL (deterministic, independent of eps)."""
    prior_var = float(prior_sigma) ** 2

    def kl(mu, rho):
        std = _softplus(rho)
        var = std * std
        return 0.5 * jnp.sum(jnp.log(prior_var / var)
                             + (var + (mu - prior_mu) ** 2) / prior_var - 1.0)

    total = jnp.float32(0.0)
    for (wmu, wrho, bmu, brho) in _iter_layers(params):
        total = total + kl(wmu, wrho) + kl(bmu, brho)
    return total


if __name__ == "__main__":
    key = jax.random.PRNGKey(0)
    k_params, k_eps, k_x = jax.random.split(key, 3)

    # input layer 16 -> 128, two residual blocks at hidden = 128 (multiples of 128 keep the
    # hot matmuls lane-dense), last layer 128 -> 8.  batch = 256 = 2 x 128-row tiles so the
    # MXU M dimension is full and the parallel batch axis is exercised.
    layers = [16, 128, 128, 128, 8]
    batch = 256

    params = init_model_params(k_params, layers)
    x = jax.random.normal(k_x, (batch, layers[0]), jnp.float32)
    eps = sample_eps(k_eps, params)

    out, kl_total = bbp_model_res(params, eps, x)
    out = jax.block_until_ready(out)
    kl_total = jax.block_until_ready(kl_total)

    assert out.shape == (batch, layers[-1])
    assert bool(jnp.all(jnp.isfinite(out)))
    assert bool(jnp.isfinite(kl_total))

    # Forward check against a pure-JAX reference using the SAME eps (bf16 matmul, f32 acc;
    # bf16 rounding vs the pure-f32 torch reference is acknowledged and bounded).
    ref = forward_reference(params, eps, x, mimic_bf16=True)
    max_err = float(jnp.max(jnp.abs(out - ref)))
    assert max_err < 2e-3, max_err

    # KL check against the closed-form f32 reference (KL is eps-independent).
    kl_ref = kl_reference(params)
    rel_err = abs(float(kl_total) - float(kl_ref)) / max(1.0, abs(float(kl_ref)))
    assert rel_err < 1e-3, (float(kl_total), float(kl_ref))

    print("KERNEL_OK")
</pallas_src>

<mosaic_0001>
module attributes {stable_mosaic.version = 11 : i64} {
  func.func @_forward_kernel(%arg0: i32, %arg1: i32, %arg2: memref<128x16xf32, #tpu.memory_space<vmem>>, %arg3: memref<3x16x128xf32, #tpu.memory_space<vmem>>, %arg4: memref<3x1x128xf32, #tpu.memory_space<vmem>>, %arg5: memref<1x3x128x128xf32, #tpu.memory_space<vmem>>, %arg6: memref<1x3x1x128xf32, #tpu.memory_space<vmem>>, %arg7: memref<3x128x8xf32, #tpu.memory_space<vmem>>, %arg8: memref<3x1x8xf32, #tpu.memory_space<vmem>>, %arg9: memref<128x8xf32, #tpu.memory_space<vmem>>, %arg10: memref<128x128xf32, #tpu.memory_space<vmem>>, %arg11: memref<128x128xf32, #tpu.memory_space<vmem>>) attributes {dimension_semantics = [#tpu.dimension_semantics<parallel>, #tpu.dimension_semantics<arbitrary>], iteration_bounds = array<i64: 2, 4>, scalar_prefetch = 0 : i64, scratch_operands = 2 : i64, tpu.core_type = #tpu.core_type<tc>, window_params = [{transform_indices = @transform_0, window_bounds = array<i64: 128, 16>}, {pipeline_mode = #tpu.pipeline_mode<synchronous>, transform_indices = @transform_1, window_bounds = array<i64: 3, 16, 128>}, {pipeline_mode = #tpu.pipeline_mode<synchronous>, transform_indices = @transform_2, window_bounds = array<i64: 3, 1, 128>}, {transform_indices = @transform_3, window_bounds = array<i64: 1, 3, 128, 128>}, {transform_indices = @transform_4, window_bounds = array<i64: 1, 3, 1, 128>}, {pipeline_mode = #tpu.pipeline_mode<synchronous>, transform_indices = @transform_5, window_bounds = array<i64: 3, 128, 8>}, {pipeline_mode = #tpu.pipeline_mode<synchronous>, transform_indices = @transform_6, window_bounds = array<i64: 3, 1, 8>}, {transform_indices = @transform_7, window_bounds = array<i64: 128, 8>}]} {
    %c0_i32 = arith.constant 0 : i32
    %0 = arith.cmpi eq, %arg1, %c0_i32 : i32
    %1 = arith.extui %0 : i1 to i32
    %c0_i32_0 = arith.constant 0 : i32
    %2 = arith.cmpi ne, %1, %c0_i32_0 : i32
    scf.if %2 {
      %c0_37 = arith.constant 0 : index
      %c0_38 = arith.constant 0 : index
      %87 = vector.load %arg2[%c0_37, %c0_38] : memref<128x16xf32, #tpu.memory_space<vmem>>, vector<128x16xf32>
      %c0_39 = arith.constant 0 : index
      %c0_40 = arith.constant 0 : index
      %c0_41 = arith.constant 0 : index
      %88 = vector.load %arg3[%c0_39, %c0_40, %c0_41] : memref<3x16x128xf32, #tpu.memory_space<vmem>>, vector<3x16x128xf32>
      %c0_42 = arith.constant 0 : index
      %c0_43 = arith.constant 0 : index
      %c0_44 = arith.constant 0 : index
      %89 = vector.load %arg4[%c0_42, %c0_43, %c0_44] : memref<3x1x128xf32, #tpu.memory_space<vmem>>, vector<3x1x128xf32>
      %90 = vector.extract_strided_slice %88 {offsets = [0, 0, 0], sizes = [1, 16, 128], strides = [1, 1, 1]} : vector<3x16x128xf32> to vector<1x16x128xf32>
      %91 = vector.shape_cast %90 : vector<1x16x128xf32> to vector<16x128xf32>
      %92 = vector.extract_strided_slice %88 {offsets = [2, 0, 0], sizes = [1, 16, 128], strides = [1, 1, 1]} : vector<3x16x128xf32> to vector<1x16x128xf32>
      %93 = vector.shape_cast %92 : vector<1x16x128xf32> to vector<16x128xf32>
      %94 = vector.extract_strided_slice %88 {offsets = [1, 0, 0], sizes = [1, 16, 128], strides = [1, 1, 1]} : vector<3x16x128xf32> to vector<1x16x128xf32>
      %95 = vector.shape_cast %94 : vector<1x16x128xf32> to vector<16x128xf32>
      %cst_45 = arith.constant 0.000000e+00 : f32
      %96 = vector.broadcast %cst_45 : f32 to vector<16x128xf32>
      %97 = arith.maximumf %95, %96 : vector<16x128xf32>
      %98 = math.absf %95 : vector<16x128xf32>
      %cst_46 = arith.constant 0.000000e+00 : f32
      %99 = vector.broadcast %cst_46 : f32 to vector<16x128xf32>
      %100 = arith.subf %99, %98 : vector<16x128xf32>
      %101 = math.exp %100 : vector<16x128xf32>
      %102 = math.log1p %101 : vector<16x128xf32>
      %103 = arith.addf %97, %102 : vector<16x128xf32>
      %104 = arith.mulf %93, %103 : vector<16x128xf32>
      %105 = arith.addf %91, %104 : vector<16x128xf32>
      %106 = vector.extract_strided_slice %89 {offsets = [0, 0, 0], sizes = [1, 1, 128], strides = [1, 1, 1]} : vector<3x1x128xf32> to vector<1x1x128xf32>
      %107 = vector.shape_cast %106 : vector<1x1x128xf32> to vector<1x128xf32>
      %108 = vector.extract_strided_slice %89 {offsets = [2, 0, 0], sizes = [1, 1, 128], strides = [1, 1, 1]} : vector<3x1x128xf32> to vector<1x1x128xf32>
      %109 = vector.shape_cast %108 : vector<1x1x128xf32> to vector<1x128xf32>
      %110 = vector.extract_strided_slice %89 {offsets = [1, 0, 0], sizes = [1, 1, 128], strides = [1, 1, 1]} : vector<3x1x128xf32> to vector<1x1x128xf32>
      %111 = vector.shape_cast %110 : vector<1x1x128xf32> to vector<1x128xf32>
      %cst_47 = arith.constant 0.000000e+00 : f32
      %112 = vector.broadcast %cst_47 : f32 to vector<1x128xf32>
      %113 = arith.maximumf %111, %112 : vector<1x128xf32>
      %114 = math.absf %111 : vector<1x128xf32>
      %cst_48 = arith.constant 0.000000e+00 : f32
      %115 = vector.broadcast %cst_48 : f32 to vector<1x128xf32>
      %116 = arith.subf %115, %114 : vector<1x128xf32>
      %117 = math.exp %116 : vector<1x128xf32>
      %118 = math.log1p %117 : vector<1x128xf32>
      %119 = arith.addf %113, %118 : vector<1x128xf32>
      %120 = arith.mulf %109, %119 : vector<1x128xf32>
      %121 = arith.addf %107, %120 : vector<1x128xf32>
      %122 = arith.truncf %87 : vector<128x16xf32> to vector<128x16xbf16>
      %123 = arith.truncf %105 : vector<16x128xf32> to vector<16x128xbf16>
      %cst_49 = arith.constant dense<0.000000e+00> : vector<128x128xf32>
      %124 = tpu.matmul %122, %123, %cst_49 {dimension_numbers = #tpu.dot_dimension_numbers<[1], [0], [0], [1], [0, 0, 1, 1], [], []>} : vector<128x16xbf16>, vector<16x128xbf16>, vector<128x128xf32> -> vector<128x128xf32>
      %125 = vector.broadcast %121 : vector<1x128xf32> to vector<128x128xf32>
      %126 = arith.addf %124, %125 : vector<128x128xf32>
      %cst_50 = arith.constant 0.000000e+00 : f32
      %127 = vector.broadcast %cst_50 : f32 to vector<128x128xf32>
      %128 = arith.maximumf %126, %127 : vector<128x128xf32>
      %c0_51 = arith.constant 0 : index
      %c0_52 = arith.constant 0 : index
      %129 = vector.load %arg10[%c0_51, %c0_52] : memref<128x128xf32, #tpu.memory_space<vmem>>, vector<128x128xf32>
      tpu.vector_store %arg10[%c0_51, %c0_52], %128 {strides = array<i32>} : memref<128x128xf32, #tpu.memory_space<vmem>>, vector<128x128xf32>,
    } else {
    }
    %c2_i32 = arith.constant 2 : i32
    %c0_i32_1 = arith.constant 0 : i32
    %3 = arith.cmpi eq, %c2_i32, %c0_i32_1 : i32
    %c1_i32 = arith.constant 1 : i32
    %4 = arith.select %3, %c1_i32, %c2_i32 : i32
    %5 = arith.remsi %arg1, %4 : i32
    %c0_i32_2 = arith.constant 0 : i32
    %6 = arith.cmpi ne, %5, %c0_i32_2 : i32
    %c0_i32_3 = arith.constant 0 : i32
    %7 = arith.cmpi slt, %5, %c0_i32_3 : i32
    %c0_i32_4 = arith.constant 0 : i32
    %8 = arith.cmpi slt, %4, %c0_i32_4 : i32
    %9 = arith.xori %7, %8 : i1
    %10 = arith.andi %9, %6 : i1
    %11 = arith.addi %5, %4 : i32
    %12 = arith.select %10, %11, %5 : i32
    %c0_i32_5 = arith.constant 0 : i32
    %13 = arith.cmpi eq, %12, %c0_i32_5 : i32
    %14 = arith.extui %13 : i1 to i32
    %c0_i32_6 = arith.constant 0 : i32
    %15 = arith.cmpi ne, %14, %c0_i32_6 : i32
    scf.if %15 {
      %c0_37 = arith.constant 0 : index
      %c0_38 = arith.constant 0 : index
      %87 = vector.load %arg10[%c0_37, %c0_38] : memref<128x128xf32, #tpu.memory_space<vmem>>, vector<128x128xf32>
      %c0_39 = arith.constant 0 : index
      %c0_40 = arith.constant 0 : index
      %88 = vector.load %arg11[%c0_39, %c0_40] : memref<128x128xf32, #tpu.memory_space<vmem>>, vector<128x128xf32>
      tpu.vector_store %arg11[%c0_39, %c0_40], %87 {strides = array<i32>} : memref<128x128xf32, #tpu.memory_space<vmem>>, vector<128x128xf32>,
    } else {
    }
    %c0 = arith.constant 0 : index
    %c0_7 = arith.constant 0 : index
    %16 = vector.load %arg10[%c0, %c0_7] : memref<128x128xf32, #tpu.memory_space<vmem>>, vector<128x128xf32>
    %c0_8 = arith.constant 0 : index
    %c0_9 = arith.constant 0 : index
    %c0_10 = arith.constant 0 : index
    %c0_11 = arith.constant 0 : index
    %17 = vector.load %arg5[%c0_8, %c0_9, %c0_10, %c0_11] : memref<1x3x128x128xf32, #tpu.memory_space<vmem>>, vector<1x3x128x128xf32>
    %18 = vector.shape_cast %17 : vector<1x3x128x128xf32> to vector<3x128x128xf32>
    %c0_12 = arith.constant 0 : index
    %c0_13 = arith.constant 0 : index
    %c0_14 = arith.constant 0 : index
    %c0_15 = arith.constant 0 : index
    %19 = vector.load %arg6[%c0_12, %c0_13, %c0_14, %c0_15] : memref<1x3x1x128xf32, #tpu.memory_space<vmem>>, vector<1x3x1x128xf32>
    %20 = vector.shape_cast %19 : vector<1x3x1x128xf32> to vector<3x1x128xf32>
    %21 = vector.extract_strided_slice %18 {offsets = [0, 0, 0], sizes = [1, 128, 128], strides = [1, 1, 1]} : vector<3x128x128xf32> to vector<1x128x128xf32>
    %22 = vector.shape_cast %21 : vector<1x128x128xf32> to vector<128x128xf32>
    %23 = vector.extract_strided_slice %18 {offsets = [2, 0, 0], sizes = [1, 128, 128], strides = [1, 1, 1]} : vector<3x128x128xf32> to vector<1x128x128xf32>
    %24 = vector.shape_cast %23 : vector<1x128x128xf32> to vector<128x128xf32>
    %25 = vector.extract_strided_slice %18 {offsets = [1, 0, 0], sizes = [1, 128, 128], strides = [1, 1, 1]} : vector<3x128x128xf32> to vector<1x128x128xf32>
    %26 = vector.shape_cast %25 : vector<1x128x128xf32> to vector<128x128xf32>
    %cst = arith.constant 0.000000e+00 : f32
    %27 = vector.broadcast %cst : f32 to vector<128x128xf32>
    %28 = arith.maximumf %26, %27 : vector<128x128xf32>
    %29 = math.absf %26 : vector<128x128xf32>
    %cst_16 = arith.constant 0.000000e+00 : f32
    %30 = vector.broadcast %cst_16 : f32 to vector<128x128xf32>
    %31 = arith.subf %30, %29 : vector<128x128xf32>
    %32 = math.exp %31 : vector<128x128xf32>
    %33 = math.log1p %32 : vector<128x128xf32>
    %34 = arith.addf %28, %33 : vector<128x128xf32>
    %35 = arith.mulf %24, %34 : vector<128x128xf32>
    %36 = arith.addf %22, %35 : vector<128x128xf32>
    %37 = vector.extract_strided_slice %20 {offsets = [0, 0, 0], sizes = [1, 1, 128], strides = [1, 1, 1]} : vector<3x1x128xf32> to vector<1x1x128xf32>
    %38 = vector.shape_cast %37 : vector<1x1x128xf32> to vector<1x128xf32>
    %39 = vector.extract_strided_slice %20 {offsets = [2, 0, 0], sizes = [1, 1, 128], strides = [1, 1, 1]} : vector<3x1x128xf32> to vector<1x1x128xf32>
    %40 = vector.shape_cast %39 : vector<1x1x128xf32> to vector<1x128xf32>
    %41 = vector.extract_strided_slice %20 {offsets = [1, 0, 0], sizes = [1, 1, 128], strides = [1, 1, 1]} : vector<3x1x128xf32> to vector<1x1x128xf32>
    %42 = vector.shape_cast %41 : vector<1x1x128xf32> to vector<1x128xf32>
    %cst_17 = arith.constant 0.000000e+00 : f32
    %43 = vector.broadcast %cst_17 : f32 to vector<1x128xf32>
    %44 = arith.maximumf %42, %43 : vector<1x128xf32>
    %45 = math.absf %42 : vector<1x128xf32>
    %cst_18 = arith.constant 0.000000e+00 : f32
    %46 = vector.broadcast %cst_18 : f32 to vector<1x128xf32>
    %47 = arith.subf %46, %45 : vector<1x128xf32>
    %48 = math.exp %47 : vector<1x128xf32>
    %49 = math.log1p %48 : vector<1x128xf32>
    %50 = arith.addf %44, %49 : vector<1x128xf32>
    %51 = arith.mulf %40, %50 : vector<1x128xf32>
    %52 = arith.addf %38, %51 : vector<1x128xf32>
    %53 = arith.truncf %16 : vector<128x128xf32> to vector<128x128xbf16>
    %54 = arith.truncf %36 : vector<128x128xf32> to vector<128x128xbf16>
    %cst_19 = arith.constant dense<0.000000e+00> : vector<128x128xf32>
    %55 = tpu.matmul %53, %54, %cst_19 {dimension_numbers = #tpu.dot_dimension_numbers<[1], [0], [0], [1], [0, 0, 1, 1], [], []>} : vector<128x128xbf16>, vector<128x128xbf16>, vector<128x128xf32> -> vector<128x128xf32>
    %56 = vector.broadcast %52 : vector<1x128xf32> to vector<128x128xf32>
    %57 = arith.addf %55, %56 : vector<128x128xf32>
    %c2_i32_20 = arith.constant 2 : i32
    %c0_i32_21 = arith.constant 0 : i32
    %58 = arith.cmpi eq, %c2_i32_20, %c0_i32_21 : i32
    %c1_i32_22 = arith.constant 1 : i32
    %59 = arith.select %58, %c1_i32_22, %c2_i32_20 : i32
    %60 = arith.remsi %arg1, %59 : i32
    %c0_i32_23 = arith.constant 0 : i32
    %61 = arith.cmpi ne, %60, %c0_i32_23 : i32
    %c0_i32_24 = arith.constant 0 : i32
    %62 = arith.cmpi slt, %60, %c0_i32_24 : i32
    %c0_i32_25 = arith.constant 0 : i32
    %63 = arith.cmpi slt, %59, %c0_i32_25 : i32
    %64 = arith.xori %62, %63 : i1
    %65 = arith.andi %64, %61 : i1
    %66 = arith.addi %60, %59 : i32
    %67 = arith.select %65, %66, %60 : i32
    %c0_i32_26 = arith.constant 0 : i32
    %68 = arith.cmpi eq, %67, %c0_i32_26 : i32
    %69 = arith.extui %68 : i1 to i32
    %c0_i32_27 = arith.constant 0 : i32
    %70 = arith.cmpi ne, %69, %c0_i32_27 : i32
    scf.if %70 {
      %cst_37 = arith.constant 0.000000e+00 : f32
      %87 = vector.broadcast %cst_37 : f32 to vector<128x128xf32>
      %88 = arith.maximumf %57, %87 : vector<128x128xf32>
      %c0_38 = arith.constant 0 : index
      %c0_39 = arith.constant 0 : index
      %89 = vector.load %arg10[%c0_38, %c0_39] : memref<128x128xf32, #tpu.memory_space<vmem>>, vector<128x128xf32>
      tpu.vector_store %arg10[%c0_38, %c0_39], %88 {strides = array<i32>} : memref<128x128xf32, #tpu.memory_space<vmem>>, vector<128x128xf32>,
    } else {
    }
    %c2_i32_28 = arith.constant 2 : i32
    %c0_i32_29 = arith.constant 0 : i32
    %71 = arith.cmpi eq, %c2_i32_28, %c0_i32_29 : i32
    %c1_i32_30 = arith.constant 1 : i32
    %72 = arith.select %71, %c1_i32_30, %c2_i32_28 : i32
    %73 = arith.remsi %arg1, %72 : i32
    %c0_i32_31 = arith.constant 0 : i32
    %74 = arith.cmpi ne, %73, %c0_i32_31 : i32
    %c0_i32_32 = arith.constant 0 : i32
    %75 = arith.cmpi slt, %73, %c0_i32_32 : i32
    %c0_i32_33 = arith.constant 0 : i32
    %76 = arith.cmpi slt, %72, %c0_i32_33 : i32
    %77 = arith.xori %75, %76 : i1
    %78 = arith.andi %77, %74 : i1
    %79 = arith.addi %73, %72 : i32
    %80 = arith.select %78, %79, %73 : i32
    %c1_i32_34 = arith.constant 1 : i32
    %81 = arith.cmpi eq, %80, %c1_i32_34 : i32
    %82 = arith.extui %81 : i1 to i32
    %c0_i32_35 = arith.constant 0 : i32
    %83 = arith.cmpi ne, %82, %c0_i32_35 : i32
    scf.if %83 {
      %c0_37 = arith.constant 0 : index
      %c0_38 = arith.constant 0 : index
      %87 = vector.load %arg11[%c0_37, %c0_38] : memref<128x128xf32, #tpu.memory_space<vmem>>, vector<128x128xf32>
      %88 = arith.addf %57, %87 : vector<128x128xf32>
      %cst_39 = arith.constant 0.000000e+00 : f32
      %89 = vector.broadcast %cst_39 : f32 to vector<128x128xf32>
      %90 = arith.maximumf %88, %89 : vector<128x128xf32>
      %c0_40 = arith.constant 0 : index
      %c0_41 = arith.constant 0 : index
      %91 = vector.load %arg10[%c0_40, %c0_41] : memref<128x128xf32, #tpu.memory_space<vmem>>, vector<128x128xf32>
      tpu.vector_store %arg10[%c0_40, %c0_41], %90 {strides = array<i32>} : memref<128x128xf32, #tpu.memory_space<vmem>>, vector<128x128xf32>,
    } else {
    }
    %c3_i32 = arith.constant 3 : i32
    %84 = arith.cmpi eq, %arg1, %c3_i32 : i32
    %85 = arith.extui %84 : i1 to i32
    %c0_i32_36 = arith.constant 0 : i32
    %86 = arith.cmpi ne, %85, %c0_i32_36 : i32
    scf.if %86 {
      %c0_37 = arith.constant 0 : index
      %c0_38 = arith.constant 0 : index
      %87 = vector.load %arg10[%c0_37, %c0_38] : memref<128x128xf32, #tpu.memory_space<vmem>>, vector<128x128xf32>
      %c0_39 = arith.constant 0 : index
      %c0_40 = arith.constant 0 : index
      %c0_41 = arith.constant 0 : index
      %88 = vector.load %arg7[%c0_39, %c0_40, %c0_41] : memref<3x128x8xf32, #tpu.memory_space<vmem>>, vector<3x128x8xf32>
      %c0_42 = arith.constant 0 : index
      %c0_43 = arith.constant 0 : index
      %c0_44 = arith.constant 0 : index
      %89 = vector.load %arg8[%c0_42, %c0_43, %c0_44] : memref<3x1x8xf32, #tpu.memory_space<vmem>>, vector<3x1x8xf32>
      %90 = vector.extract_strided_slice %88 {offsets = [0, 0, 0], sizes = [1, 128, 8], strides = [1, 1, 1]} : vector<3x128x8xf32> to vector<1x128x8xf32>
      %91 = vector.shape_cast %90 : vector<1x128x8xf32> to vector<128x8xf32>
      %92 = vector.extract_strided_slice %88 {offsets = [2, 0, 0], sizes = [1, 128, 8], strides = [1, 1, 1]} : vector<3x128x8xf32> to vector<1x128x8xf32>
      %93 = vector.shape_cast %92 : vector<1x128x8xf32> to vector<128x8xf32>
      %94 = vector.extract_strided_slice %88 {offsets = [1, 0, 0], sizes = [1, 128, 8], strides = [1, 1, 1]} : vector<3x128x8xf32> to vector<1x128x8xf32>
      %95 = vector.shape_cast %94 : vector<1x128x8xf32> to vector<128x8xf32>
      %cst_45 = arith.constant 0.000000e+00 : f32
      %96 = vector.broadcast %cst_45 : f32 to vector<128x8xf32>
      %97 = arith.maximumf %95, %96 : vector<128x8xf32>
      %98 = math.absf %95 : vector<128x8xf32>
      %cst_46 = arith.constant 0.000000e+00 : f32
      %99 = vector.broadcast %cst_46 : f32 to vector<128x8xf32>
      %100 = arith.subf %99, %98 : vector<128x8xf32>
      %101 = math.exp %100 : vector<128x8xf32>
      %102 = math.log1p %101 : vector<128x8xf32>
      %103 = arith.addf %97, %102 : vector<128x8xf32>
      %104 = arith.mulf %93, %103 : vector<128x8xf32>
      %105 = arith.addf %91, %104 : vector<128x8xf32>
      %106 = vector.extract_strided_slice %89 {offsets = [0, 0, 0], sizes = [1, 1, 8], strides = [1, 1, 1]} : vector<3x1x8xf32> to vector<1x1x8xf32>
      %107 = vector.shape_cast %106 : vector<1x1x8xf32> to vector<1x8xf32>
      %108 = vector.extract_strided_slice %89 {offsets = [2, 0, 0], sizes = [1, 1, 8], strides = [1, 1, 1]} : vector<3x1x8xf32> to vector<1x1x8xf32>
      %109 = vector.shape_cast %108 : vector<1x1x8xf32> to vector<1x8xf32>
      %110 = vector.extract_strided_slice %89 {offsets = [1, 0, 0], sizes = [1, 1, 8], strides = [1, 1, 1]} : vector<3x1x8xf32> to vector<1x1x8xf32>
      %111 = vector.shape_cast %110 : vector<1x1x8xf32> to vector<1x8xf32>
      %cst_47 = arith.constant 0.000000e+00 : f32
      %112 = vector.broadcast %cst_47 : f32 to vector<1x8xf32>
      %113 = arith.maximumf %111, %112 : vector<1x8xf32>
      %114 = math.absf %111 : vector<1x8xf32>
      %cst_48 = arith.constant 0.000000e+00 : f32
      %115 = vector.broadcast %cst_48 : f32 to vector<1x8xf32>
      %116 = arith.subf %115, %114 : vector<1x8xf32>
      %117 = math.exp %116 : vector<1x8xf32>
      %118 = math.log1p %117 : vector<1x8xf32>
      %119 = arith.addf %113, %118 : vector<1x8xf32>
      %120 = arith.mulf %109, %119 : vector<1x8xf32>
      %121 = arith.addf %107, %120 : vector<1x8xf32>
      %122 = arith.truncf %87 : vector<128x128xf32> to vector<128x128xbf16>
      %123 = arith.truncf %105 : vector<128x8xf32> to vector<128x8xbf16>
      %cst_49 = arith.constant dense<0.000000e+00> : vector<128x8xf32>
      %124 = tpu.matmul %122, %123, %cst_49 {dimension_numbers = #tpu.dot_dimension_numbers<[1], [0], [0], [1], [0, 0, 1, 1], [], []>} : vector<128x128xbf16>, vector<128x8xbf16>, vector<128x8xf32> -> vector<128x8xf32>
      %125 = vector.broadcast %121 : vector<1x8xf32> to vector<128x8xf32>
      %126 = arith.addf %124, %125 : vector<128x8xf32>
      %c0_50 = arith.constant 0 : index
      %c0_51 = arith.constant 0 : index
      %127 = vector.load %arg9[%c0_50, %c0_51] : memref<128x8xf32, #tpu.memory_space<vmem>>, vector<128x8xf32>
      tpu.vector_store %arg9[%c0_50, %c0_51], %126 {strides = array<i32>} : memref<128x8xf32, #tpu.memory_space<vmem>>, vector<128x8xf32>,
    } else {
    }
    return
  }
  func.func @transform_0(%arg0: i32, %arg1: i32) -> (i32, i32) {
    %c0_i32 = arith.constant 0 : i32
    %c0_i32_0 = arith.constant 0 : i32
    return %arg0, %c0_i32 : i32, i32
  }
  func.func @transform_1(%arg0: i32, %arg1: i32) -> (i32, i32, i32) {
    %c0_i32 = arith.constant 0 : i32
    %c0_i32_0 = arith.constant 0 : i32
    %c0_i32_1 = arith.constant 0 : i32
    %c0_i32_2 = arith.constant 0 : i32
    return %c0_i32, %c0_i32_0, %c0_i32_1 : i32, i32, i32
  }
  func.func @transform_2(%arg0: i32, %arg1: i32) -> (i32, i32, i32) {
    %c0_i32 = arith.constant 0 : i32
    %c0_i32_0 = arith.constant 0 : i32
    %c0_i32_1 = arith.constant 0 : i32
    %c0_i32_2 = arith.constant 0 : i32
    return %c0_i32, %c0_i32_0, %c0_i32_1 : i32, i32, i32
  }
  func.func @transform_3(%arg0: i32, %arg1: i32) -> (i32, i32, i32, i32) {
    %c0_i32 = arith.constant 0 : i32
    %c0_i32_0 = arith.constant 0 : i32
    %c0_i32_1 = arith.constant 0 : i32
    %c0_i32_2 = arith.constant 0 : i32
    return %arg1, %c0_i32, %c0_i32_0, %c0_i32_1 : i32, i32, i32, i32
  }
  func.func @transform_4(%arg0: i32, %arg1: i32) -> (i32, i32, i32, i32) {
    %c0_i32 = arith.constant 0 : i32
    %c0_i32_0 = arith.constant 0 : i32
    %c0_i32_1 = arith.constant 0 : i32
    %c0_i32_2 = arith.constant 0 : i32
    return %arg1, %c0_i32, %c0_i32_0, %c0_i32_1 : i32, i32, i32, i32
  }
  func.func @transform_5(%arg0: i32, %arg1: i32) -> (i32, i32, i32) {
    %c0_i32 = arith.constant 0 : i32
    %c0_i32_0 = arith.constant 0 : i32
    %c0_i32_1 = arith.constant 0 : i32
    %c0_i32_2 = arith.constant 0 : i32
    return %c0_i32, %c0_i32_0, %c0_i32_1 : i32, i32, i32
  }
  func.func @transform_6(%arg0: i32, %arg1: i32) -> (i32, i32, i32) {
    %c0_i32 = arith.constant 0 : i32
    %c0_i32_0 = arith.constant 0 : i32
    %c0_i32_1 = arith.constant 0 : i32
    %c0_i32_2 = arith.constant 0 : i32
    return %c0_i32, %c0_i32_0, %c0_i32_1 : i32, i32, i32
  }
  func.func @transform_7(%arg0: i32, %arg1: i32) -> (i32, i32) {
    %c0_i32 = arith.constant 0 : i32
    %c0_i32_0 = arith.constant 0 : i32
    return %arg0, %c0_i32 : i32, i32
  }
}

</mosaic_0001>

<bundles_post_ra>
// kernel: tpu_custom_call.1
= control target key start
LH: loop header
LB: loop body
LE: loop exit
PB: predicated region body
PF: predicated region fallthrough
CT: control target
= control target key end

     0   :  { %12 = vsyncpa [#allocation5], 0  ;;  %s2908_s0 = inlined_call_operand.vmem [shape: f32[256,16], index: 0, kind: input, shape index: {}]   ;;  %s2909_s1 = inlined_call_operand.vmem [shape: f32[3,16,128], index: 1, kind: input, shape index: {}]   ;;  %s2910_s2 = inlined_call_operand.vmem [shape: f32[3,1,128], index: 2, kind: input, shape index: {}]   ;;  %s2911_s3 = inlined_call_operand.hbm [shape: f32[4,3,128,128], index: 3, kind: input, shape index: {}]   ;;  %s2912_s4 = inlined_call_operand.vmem [shape: f32[4,3,1,128], index: 4, kind: input, shape index: {}]   ;;  %s2913_s5 = inlined_call_operand.vmem [shape: f32[3,128,8], index: 5, kind: input, shape index: {}]   ;;  %s2914_s6 = inlined_call_operand.vmem [shape: f32[3,1,8], index: 6, kind: input, shape index: {}]   ;;  %s2915_s7 = inlined_call_operand.vmem [shape: f32[256,8], index: 7, kind: output, shape index: {}]  }
   0x1   :  { %14 = vsyncpa [#allocation5 + $0x1], 0  ;;  %s2119_s24 = smov 0   ;;  %s2121_s25 = smov 0  }
   0x2   :  { %s2123_s26 = smov 0   ;;  %s2125_s27 = smov 0  }
   0x3   :  { %s2127_s28 = smov 0   ;;  %s2129_s29 = smov 0  }
   0x4   :  { %s2131_s30 = smov 0   ;;  %s2133_s8 = smov 0  }
   0x5 LB: > { %2918 = sst [smem:[#allocation7_spill]] %s2071_s30  ;;  %s1675_s9 = sadd.s32 4294967295, %s2075_s8   ;;  %s2075_s8 = sphi %s2133_s8, %s20_s8   ;;  %s2071_s30 = sphi %s2131_s30, %s2980_s30   ;;  %s2067_s29 = sphi %s2129_s29, %s2985_s29   ;;  %s2063_s28 = sphi %s2127_s28, %s2978_s28   ;;  %s2059_s27 = sphi %s2125_s27, %s2984_s27   ;;  %s2055_s26 = sphi %s2123_s26, %s2983_s26   ;;  %s2051_s25 = sphi %s2121_s25, %s2982_s25   ;;  %s2047_s24 = sphi %s2119_s24, %s2981_s24  }
   0x6   : > { %s29_s10 = sadd.s32 1, %s2067_s29  ;;  %s32_s11 = sadd.s32 1, %s2071_s30 }
   0x7   : > { %p30_p0 = scmp.ge.s32.totalorder %s29_s10, 4  ;;  %s107_s12 = sadd.s32 1, %s2055_s26 }
   0x8   : > { %p114_p1 = scmp.ne.s32.totalorder %s2055_s26, %s2051_s25  ;;  %p115_p2 = scmp.eq.s32.totalorder %s2075_s8, 0 }
   0x9   : > { %s2987_s10 = smov (%p30_p0, %s29_s10), 0  ;;  %s2989_s11 = smov (!%p30_p0, %s32_s11), %s2071_s30 }
   0xa   : > { %2919 = sst [smem:[#allocation8_spill]] %s2987_s10  ;;  %s104_s13 = ssub.s32 %s2067_s29, %s2987_s10 }
   0xb   : > { %p34_p3 = scmp.ge.s32.totalorder %s2989_s11, 2  ;;  %p105_p4 = scmp.eq.s32.totalorder %s104_s13, 0 }
   0xc   : > { %p116_p5 = por %p115_p2, %p114_p1  ;;  %p120_p6 = scmp.ne.s32.totalorder %s2051_s25, %s2047_s24 }
   0xd   : > { %s2991_s11 = smov (%p34_p3, %s2989_s11), 0  ;;  %p121_p7 = scmp.eq.s32.totalorder %s1675_s9, 0 }
   0xe   : > { %2920 = sst [smem:[#allocation9_spill]] %s2991_s11  ;;  %p1764_p8 = scmp.lt.s32.totalorder %s2075_s8, 8 }
   0xf   : > { %s2173_s14 = scalar_select %p105_p4, %s2055_s26, %s107_s12  }
  0x10   : > { %s259_s15 = sand.u32 1, %s2055_s26   ;;  %p2177_p9 = por %p121_p7, %p120_p6 }
  0x11   : > { %s1754_s17 = smul.u32 384, %s259_s15  ;;  %p1761_p10 = pnand %p1764_p8, %p116_p5 }
  0x12   : > { %s1755_s18 = smul.u32 384, %s2067_s29  ;;  %s260_s9 = scalar_lea.sflag [#allocation5], %s259_s15 }
  0x13   : > { %s263_s22 = scalar_lea.vmem [#allocation4], %s1754_s17  ;;  %s2077_s12 = smov 128  }
  0x14   : > { %s268_s21 = scalar_lea.hbm %s2911_s3, %s1755_s18  ;;  %s271_s23 = sshll.u32 %s263_s22, 4  ;;  %s272_s23 = int_to_ptr.vmem [resolvable:$true] %s271_s23 }
  0x15   : > { %s269_s24 = sshll.u32 %s268_s21, 4  ;;  %s2078_s13 = smov 8   ;;  %s270_s24 = int_to_ptr.hbm [resolvable:$true] %s269_s24 }
  0x16   : > { %1763 = dma.hbm_to_vmem [thread:$0]  (!%p1761_p10), %s270_s24, 6144, %s272_s23, %s260_s9, %s2077_s12, %s2077_s12, %s2078_s13  }
  0x17   : > { %p1680_p11 = scmp.ge.s32.totalorder %s2075_s8, 1  ;;  %p286_p12 = scmp.lt.s32.totalorder %s2075_s8, 9 }
  0x19   : > { %p287_p13 = pnand %p1680_p11, %p286_p12 }
  0x1a   : > { %s292_s11 = sand.u32 (!%p287_p13), 1, %s2051_s25  }
  0x1b   : > { %290 = sbr.rel (%p287_p13) target bundleno = 833 (0x341), region = 48  ;;  %s293_s30 = scalar_lea.sflag (!%p287_p13), [#allocation5], %s292_s11 }
  0x1c   : > { %s1756_s10 = smul.u32 (!%p287_p13), 384, %s292_s11 }
  0x1e   : > { %s2188_s19 = scalar_lea.vmem (!%p287_p13), [#allocation4], %s1756_s10 }
  0x20   : > { %2042 = dma.done.wait (%p2177_p9), %s293_s30, 6144  }
  0x21   : > { %2044 = vsyncadd (%p2177_p9), %s293_s30, 4294961152  ;;  %s1681_s15 = sshll.u32 %s2063_s28, 4  ;;  %p343_p0 = scmp.lt.s32.totalorder %s2059_s27, 3 }
  0x22   : > { %p338_p1 = scmp.lt.s32.totalorder %s1681_s15, 31  ;;  %p1685_p2 = scmp.ne.s32.totalorder %s2059_s27, 0 }
  0x23   : > { %s344_s17 = scalar_select %p343_p0, %s2059_s27, 3 }
  0x24   : > { %s2993_s15 = smov (!%p338_p1, %s1681_s15), 31  ;;  %357 = sbr.rel (%p1685_p2) target bundleno = 242 (0xf2), region = 56 }
  0x25   : > { %s1757_s18 = smul.u32 3, %s344_s17  ;;  %s1682_s20 = sshll.u32 %s2993_s15, 3 }
  0x26   : > { %s2200_s10 = scalar_lea.vmem %s2908_s0, %s1682_s20  ;;  %s2210_s28 = scalar_lea.vmem %s2915_s7, %s1682_s20 }
  0x27   : > { %s2205_s16 = scalar_lea.vmem %s2912_s4, %s1757_s18 }
  0x29   : > { %v376_v0 = vld [vmem:[%s2909_s1 + $0x10] sm:$0xff]  ;;  %v377_v1 = vld [vmem:[%s2909_s1 + $0x18] sm:$0xff]  ;;  %v378_v26 = vld [vmem:[%s2909_s1 + $0x20] sm:$0xff]  ;;  %vm446_vm2 = vcmask 130048  }
  0x2a   : > { %v385_v2 = vand.u32 2147483647, %v376_v0  ;;  %v386_v3 = vand.u32 2147483647, %v377_v1  ;;  %v383_v20 = vmax.f32 %v376_v0, 0.0  ;;  %v384_v23 = vmax.f32 %v377_v1, 0.0 }
  0x2b   : > { %v379_v28 = vld [vmem:[%s2909_s1 + $0x28] sm:$0xff]  ;;  %v374_v31 = vld [vmem:[%s2909_s1] sm:$0xff]  ;;  %v360_v51 = vld [vmem:[%s2200_s10 + $0x10] sm:$0xff] }
  0x2c   : > { %v387_v4 = vsub.f32 0.0, %v385_v2  ;;  %v388_v5 = vsub.f32 0.0, %v386_v3  ;;  %v375_v33 = vld [vmem:[%s2909_s1 + $0x8] sm:$0xff]  ;;  %v358_v37 = vld [vmem:[%s2200_s10] sm:$0xff]  ;;  %v361_v52 = vld [vmem:[%s2200_s10 + $0x18] sm:$0xff] }
  0x2d   : > { %v359_v38 = vld [vmem:[%s2200_s10 + $0x8] sm:$0xff]  ;;  %v362_v40 = vld [vmem:[%s2200_s10 + $0x20] sm:$0xff]  ;;  %v364_v53 = vld [vmem:[%s2200_s10 + $0x30] sm:$0xff]  ;;  %v435_v59 = vpack.c.bf16 %v361_v52, %v360_v51 }
  0x2e   : > { %v389_v6 = vmul.f32 1.442695, %v387_v4  ;;  %v391_v7 = vmul.f32 1.442695, %v388_v5  ;;  %v363_v41 = vld [vmem:[%s2200_s10 + $0x28] sm:$0xff]  ;;  %v366_v42 = vld [vmem:[%s2200_s10 + $0x40] sm:$0xff]  ;;  %v434_v47 = vpack.c.bf16 %v359_v38, %v358_v37 }
  0x2f   : > { %v367_v43 = vld [vmem:[%s2200_s10 + $0x48] sm:$0xff]  ;;  %v370_v44 = vld [vmem:[%s2200_s10 + $0x60] sm:$0xff]  ;;  %v436_v48 = vpack.c.bf16 %v363_v41, %v362_v40  ;;  %v365_v54 = vld [vmem:[%s2200_s10 + $0x38] sm:$0xff] }
  0x30   : > { %1831 = vpow2.f32 %v389_v6  ;;  %v371_v45 = vld [vmem:[%s2200_s10 + $0x68] sm:$0xff]  ;;  %v438_v49 = vpack.c.bf16 %v367_v43, %v366_v42  ;;  %v368_v55 = vld [vmem:[%s2200_s10 + $0x50] sm:$0xff]  ;;  %v369_v56 = vld [vmem:[%s2200_s10 + $0x58] sm:$0xff]  ;;  %v437_v60 = vpack.c.bf16 %v365_v54, %v364_v53 }
  0x31   : > { %1833 = vpow2.f32 %v391_v7  ;;  %v440_v50 = vpack.c.bf16 %v371_v45, %v370_v44  ;;  %v372_v57 = vld [vmem:[%s2200_s10 + $0x70] sm:$0xff]  ;;  %v373_v58 = vld [vmem:[%s2200_s10 + $0x78] sm:$0xff]  ;;  %v439_v61 = vpack.c.bf16 %v369_v56, %v368_v55  ;;  %v381_v63 = vld [vmem:[%s2910_s2 + $0x1] sm:$0x1] }
  0x32   : > { %v441_v62 = vpack.c.bf16 %v373_v58, %v372_v57  ;;  %v418_v0 = vand.u32 2147483647, %v381_v63 }
  0x34   : > { %v419_v1 = vsub.f32 0.0, %v418_v0 }
  0x36   : > { %v1832_v8 = vpop.eup %1831  ;;  %v420_v2 = vmul.f32 1.442695, %v419_v1 }
  0x37   : > { %v1834_v9 = vpop.eup %1833  ;;  %v393_v10 = vadd.f32 1.0, %v1832_v8  ;;  %v396_v11 = vmul.f32 -0.5, %v1832_v8  ;;  %v399_v15 = vand.u32 2147483647, %v1832_v8 }
  0x38   : > { %v402_v12 = vadd.f32 1.0, %v1834_v9  ;;  %v405_v13 = vmul.f32 -0.5, %v1834_v9  ;;  %v408_v17 = vand.u32 2147483647, %v1834_v9 }
  0x39   : > { %1835 = vlog2.f32 %v393_v10  ;;  %v397_v14 = vadd.f32 1.0, %v396_v11  ;;  %vm400_vm0 = vcmp.lt.f32.partialorder %v399_v15, 0.0004427343  ;;  %v417_v11 = vmax.f32 %v381_v63, 0.0 }
  0x3a   : > { %1837 = vlog2.f32 %v402_v12  ;;  %v406_v16 = vadd.f32 1.0, %v405_v13  ;;  %vm409_vm1 = vcmp.lt.f32.partialorder %v408_v17, 0.0004427343 }
  0x3b   : > { %v398_v18 = vmul.f32 %v1832_v8, %v397_v14  ;;  %1839 = vpow2.f32 %v420_v2  ;;  %v382_v14 = vld [vmem:[%s2910_s2 + $0x2] sm:$0x1] }
  0x3c   : > { %v407_v21 = vmul.f32 %v1834_v9, %v406_v16  ;;  %v380_v16 = vld [vmem:[%s2910_s2] sm:$0x1] }
  0x3f   : > { %v1836_v19 = vpop.eup %1835 }
  0x40   : > { %v1838_v22 = vpop.eup %1837  ;;  %v395_v24 = vmul.f32 0.6931472, %v1836_v19 }
  0x41   : > { %v404_v25 = vmul.f32 0.6931472, %v1838_v22  ;;  %v1840_v3 = vpop.eup %1839 }
  0x42   : > { %v401_v27 = vsel %vm400_vm0, %v398_v18, %v395_v24  ;;  %v422_v4 = vadd.f32 1.0, %v1840_v3  ;;  %v425_v5 = vmul.f32 -0.5, %v1840_v3  ;;  %v428_v8 = vand.u32 2147483647, %v1840_v3 }
  0x43   : > { %v410_v29 = vsel %vm409_vm1, %v407_v21, %v404_v25  ;;  %v411_v30 = vadd.f32 %v401_v27, %v383_v20 }
  0x44   : > { %v412_v32 = vadd.f32 %v410_v29, %v384_v23  ;;  %1841 = vlog2.f32 %v422_v4  ;;  %v426_v6 = vadd.f32 1.0, %v425_v5  ;;  %vm429_vm3 = vcmp.lt.f32.partialorder %v428_v8, 0.0004427343 }
  0x45   : > { %v413_v34 = vmul.f32 %v411_v30, %v378_v26 }
  0x46   : > { %v414_v35 = vmul.f32 %v412_v32, %v379_v28  ;;  %v427_v10 = vmul.f32 %v1840_v3, %v426_v6 }
  0x47   : > { %v415_v36 = vadd.f32 %v413_v34, %v374_v31 }
  0x48   : > { %v416_v39 = vadd.f32 %v414_v35, %v375_v33 }
  0x4a   : > { %v442_v46 = vpack.c.bf16 %v416_v39, %v415_v36  ;;  %v1842_v7 = vpop.eup %1841 }
  0x4b   : > { %v424_v9 = vmul.f32 0.6931472, %v1842_v7 }
  0x4c   : > { %478 = vmatpush.bf16.msra.mxu0 %v442_v46  ;;  %1703 = vmatpush.bf16.msra.mxu1 %v442_v46 }
  0x4d   : > { %1704 = vmatpush.bf16.msra.mxu2 %v442_v46  ;;  %1705 = vmatpush.bf16.msra.mxu3 %v442_v46  ;;  %v430_v12 = vsel %vm429_vm3, %v427_v10, %v424_v9 }
  0x4e   : > { %v431_v13 = vadd.f32 %v430_v12, %v417_v11 }
  0x4f   : > { %1686 = vmatmul.msk.bf16.vlgmr.msra.gmra.mxu0 %vm446_vm2, %v434_v47  ;;  %1688 = vmatmul.msk.bf16.vlgmr.msra.gmra.mxu1 %vm446_vm2, %v436_v48 }
  0x50   : > { %1690 = vmatmul.msk.bf16.vlgmr.msra.gmra.mxu2 %vm446_vm2, %v438_v49  ;;  %1692 = vmatmul.msk.bf16.vlgmr.msra.gmra.mxu3 %vm446_vm2, %v440_v50  ;;  %v432_v15 = vmul.f32 %v431_v13, %v382_v14 }
  0x52   : > { %v433_v17 = vadd.f32 %v432_v15, %v380_v16 }
  0x54   : > { %v444_v18 = vperm.slane %v433_v17, 0 }
  0x5f   : > { %1687 = vmatmul.msk.bf16.gmra.mxu0 %vm446_vm2, %v435_v59  ;;  %1689 = vmatmul.msk.bf16.gmra.mxu1 %vm446_vm2, %v437_v60 }
  0x60   : > { %1691 = vmatmul.msk.bf16.gmra.mxu2 %vm446_vm2, %v439_v61  ;;  %1693 = vmatmul.msk.bf16.gmra.mxu3 %vm446_vm2, %v441_v62 }
  0xcc   : > { %v480_v19 = vpop.f32.mrf.mxu0  ;;  %v490_v20 = vpop.f32.mrf.mxu1 }
  0xcd   : > { %v481_v21 = vadd.f32 %v480_v19, %v444_v18  ;;  %v491_v22 = vadd.f32 %v490_v20, %v444_v18 }
  0xcf   : > { %v520_v23 = vmax.f32 %v481_v21, 0.0  ;;  %v524_v24 = vmax.f32 %v491_v22, 0.0 }
  0xd1   : > { %536 = vst [vmem:[#allocation2 + $0x30] sm:$0xff] %v520_v23 }
  0xd2   : > { %540 = vst [vmem:[#allocation2 + $0x50] sm:$0xff] %v524_v24 }
  0xd3   : > { %v500_v25 = vpop.f32.mrf.mxu2  ;;  %v510_v26 = vpop.f32.mrf.mxu3 }
  0xd4   : > { %v501_v27 = vadd.f32 %v500_v25, %v444_v18  ;;  %v511_v28 = vadd.f32 %v510_v26, %v444_v18  ;;  %v482_v29 = vpop.f32.mrf.mxu0  ;;  %v492_v30 = vpop.f32.mrf.mxu1 }
  0xd5   : > { %v483_v31 = vadd.f32 %v482_v29, %v444_v18  ;;  %v493_v32 = vadd.f32 %v492_v30, %v444_v18 }
  0xd6   : > { %v528_v33 = vmax.f32 %v501_v27, 0.0  ;;  %v532_v34 = vmax.f32 %v511_v28, 0.0 }
  0xd7   : > { %v521_v35 = vmax.f32 %v483_v31, 0.0  ;;  %v525_v36 = vmax.f32 %v493_v32, 0.0 }
  0xd8   : > { %544 = vst [vmem:[#allocation2 + $0x40] sm:$0xff] %v528_v33 }
  0xd9   : > { %548 = vst [vmem:[#allocation2 + $0x60] sm:$0xff] %v532_v34 }
  0xda   : > { %537 = vst [vmem:[#allocation2] sm:$0xff] %v521_v35 }
  0xdb   : > { %541 = vst [vmem:[#allocation2 + $0x68] sm:$0xff] %v525_v36  ;;  %v502_v37 = vpop.f32.mrf.mxu2  ;;  %v512_v38 = vpop.f32.mrf.mxu3 }
  0xdc   : > { %v503_v39 = vadd.f32 %v502_v37, %v444_v18  ;;  %v513_v40 = vadd.f32 %v512_v38, %v444_v18  ;;  %v485_v41 = vpop.f32.mrf.mxu0  ;;  %v495_v42 = vpop.f32.mrf.mxu1 }
  0xdd   : > { %v486_v43 = vadd.f32 %v485_v41, %v444_v18  ;;  %v496_v44 = vadd.f32 %v495_v42, %v444_v18 }
  0xde   : > { %v529_v45 = vmax.f32 %v503_v39, 0.0  ;;  %v533_v46 = vmax.f32 %v513_v40, 0.0 }
  0xdf   : > { %v522_v47 = vmax.f32 %v486_v43, 0.0  ;;  %v526_v48 = vmax.f32 %v496_v44, 0.0 }
  0xe0   : > { %545 = vst [vmem:[#allocation2 + $0x20] sm:$0xff] %v529_v45 }
  0xe1   : > { %549 = vst [vmem:[#allocation2 + $0x70] sm:$0xff] %v533_v46 }
  0xe2   : > { %538 = vst [vmem:[#allocation2 + $0x58] sm:$0xff] %v522_v47 }
  0xe3   : > { %542 = vst [vmem:[#allocation2 + $0x8] sm:$0xff] %v526_v48  ;;  %v505_v49 = vpop.f32.mrf.mxu2  ;;  %v515_v50 = vpop.f32.mrf.mxu3 }
  0xe4   : > { %v506_v51 = vadd.f32 %v505_v49, %v444_v18  ;;  %v516_v52 = vadd.f32 %v515_v50, %v444_v18  ;;  %v487_v53 = vpop.f32.mrf.mxu0  ;;  %v497_v54 = vpop.f32.mrf.mxu1 }
  0xe5   : > { %v488_v55 = vadd.f32 %v487_v53, %v444_v18  ;;  %v498_v56 = vadd.f32 %v497_v54, %v444_v18 }
  0xe6   : > { %v530_v57 = vmax.f32 %v506_v51, 0.0  ;;  %v534_v58 = vmax.f32 %v516_v52, 0.0 }
  0xe7   : > { %v523_v59 = vmax.f32 %v488_v55, 0.0  ;;  %v527_v60 = vmax.f32 %v498_v56, 0.0 }
  0xe8   : > { %546 = vst [vmem:[#allocation2 + $0x10] sm:$0xff] %v530_v57 }
  0xe9   : > { %550 = vst [vmem:[#allocation2 + $0x78] sm:$0xff] %v534_v58 }
  0xea   : > { %539 = vst [vmem:[#allocation2 + $0x18] sm:$0xff] %v523_v59 }
  0xeb   : > { %543 = vst [vmem:[#allocation2 + $0x48] sm:$0xff] %v527_v60  ;;  %v507_v61 = vpop.f32.mrf.mxu2  ;;  %v517_v62 = vpop.f32.mrf.mxu3 }
  0xec   : > { %v508_v63 = vadd.f32 %v507_v61, %v444_v18  ;;  %v518_v0 = vadd.f32 %v517_v62, %v444_v18 }
  0xee   : > { %v531_v1 = vmax.f32 %v508_v63, 0.0  ;;  %v535_v2 = vmax.f32 %v518_v0, 0.0 }
  0xf0   : > { %547 = vst [vmem:[#allocation2 + $0x38] sm:$0xff] %v531_v1 }
  0xf1   : > { %551 = vst [vmem:[#allocation2 + $0x28] sm:$0xff] %v535_v2 }
  0xf2 PF: > { %p552_p3 = scmp.lt.s32.totalorder %s2059_s27, 0  ;;  %s553_s17 = ssub.s32 0, %s2059_s27 }
  0xf3   : > { %s1694_s18 = smin.u32 %s2059_s27, %s553_s17 }
  0xf4   : > { %s555_s20 = sand.u32 1, %s1694_s18  }
  0xf5   : > { %s556_s21 = ssub.s32 0, %s555_s20 }
  0xf6   : > { %s2995_s21 = smov (!%p552_p3, %s556_s21), %s555_s20 }
  0xf7   : > { %p1696_p4 = scmp.lt.s32.totalorder %s2995_s21, 0  ;;  %s562_s22 = sadd.s32 2, %s2995_s21 }
  0xf9   : > { %s2997_s22 = smov (!%p1696_p4, %s562_s22), %s2995_s21 }
  0xfa   : > { %p1697_p5 = scmp.ne.s32.totalorder %s2997_s22, 0 }
  0xfc   : > { %567 = sbr.rel (%p1697_p5) target bundleno = 274 (0x112), region = 60 }
 0x101   : > { %v568_v3 = vld [vmem:[#allocation2 + $0x30] sm:$0xff]  ;;  %v569_v4 = vld [vmem:[#allocation2] sm:$0xff]  ;;  %v570_v5 = vld [vmem:[#allocation2 + $0x58] sm:$0xff] }
 0x102   : > { %584 = vst [vmem:[#allocation3 + $0x28] sm:$0xff] %v568_v3  ;;  %v571_v6 = vld [vmem:[#allocation2 + $0x18] sm:$0xff]  ;;  %v572_v7 = vld [vmem:[#allocation2 + $0x50] sm:$0xff]  ;;  %v573_v8 = vld [vmem:[#allocation2 + $0x68] sm:$0xff] }
 0x103   : > { %585 = vst [vmem:[#allocation3 + $0x68] sm:$0xff] %v569_v4  ;;  %v574_v9 = vld [vmem:[#allocation2 + $0x8] sm:$0xff]  ;;  %v576_v11 = vld [vmem:[#allocation2 + $0x40] sm:$0xff]  ;;  %v578_v13 = vld [vmem:[#allocation2 + $0x10] sm:$0xff] }
 0x104   : > { %586 = vst [vmem:[#allocation3 + $0x10] sm:$0xff] %v570_v5  ;;  %v575_v10 = vld [vmem:[#allocation2 + $0x48] sm:$0xff]  ;;  %v577_v12 = vld [vmem:[#allocation2 + $0x20] sm:$0xff]  ;;  %v579_v14 = vld [vmem:[#allocation2 + $0x38] sm:$0xff] }
 0x105   : > { %587 = vst [vmem:[#allocation3 + $0x40] sm:$0xff] %v571_v6  ;;  %v580_v15 = vld [vmem:[#allocation2 + $0x60] sm:$0xff]  ;;  %v581_v16 = vld [vmem:[#allocation2 + $0x70] sm:$0xff]  ;;  %v582_v17 = vld [vmem:[#allocation2 + $0x78] sm:$0xff] }
 0x106   : > { %588 = vst [vmem:[#allocation3 + $0x48] sm:$0xff] %v572_v7  ;;  %v583_v18 = vld [vmem:[#allocation2 + $0x28] sm:$0xff] }
 0x107   : > { %589 = vst [vmem:[#allocation3 + $0x30] sm:$0xff] %v573_v8 }
 0x108   : > { %590 = vst [vmem:[#allocation3 + $0x70] sm:$0xff] %v574_v9 }
 0x109   : > { %591 = vst [vmem:[#allocation3 + $0x38] sm:$0xff] %v575_v10 }
 0x10a   : > { %592 = vst [vmem:[#allocation3 + $0x20] sm:$0xff] %v576_v11 }
 0x10b   : > { %593 = vst [vmem:[#allocation3 + $0x78] sm:$0xff] %v577_v12 }
 0x10c   : > { %594 = vst [vmem:[#allocation3 + $0x18] sm:$0xff] %v578_v13 }
 0x10d   : > { %595 = vst [vmem:[#allocation3 + $0x58] sm:$0xff] %v579_v14 }
 0x10e   : > { %596 = vst [vmem:[#allocation3] sm:$0xff] %v580_v15 }
 0x10f   : > { %597 = vst [vmem:[#allocation3 + $0x8] sm:$0xff] %v581_v16 }
 0x110   : > { %598 = vst [vmem:[#allocation3 + $0x60] sm:$0xff] %v582_v17 }
 0x111   : > { %599 = vst [vmem:[#allocation3 + $0x50] sm:$0xff] %v583_v18 }
 0x112 PF: > { %v2273_v19 = vld [vmem:[%s2188_s19 + $0xf0] sm:$0xff]  ;;  %v2276_v20 = vld [vmem:[%s2188_s19 + $0xf8] sm:$0xff]  ;;  %v2281_v23 = vld [vmem:[%s2188_s19 + $0xe0] sm:$0xff] }
 0x113   : > { %v697_v21 = vand.u32 2147483647, %v2273_v19  ;;  %v698_v22 = vand.u32 2147483647, %v2276_v20  ;;  %v2284_v24 = vld [vmem:[%s2188_s19 + $0xe8] sm:$0xff]  ;;  %v2289_v29 = vld [vmem:[%s2188_s19 + $0xd0] sm:$0xff] }
 0x114   : > { %v695_v27 = vand.u32 2147483647, %v2281_v23  ;;  %v696_v28 = vand.u32 2147483647, %v2284_v24  ;;  %v2292_v31 = vld [vmem:[%s2188_s19 + $0xd8] sm:$0xff]  ;;  %v2297_v37 = vld [vmem:[%s2188_s19 + $0xc0] sm:$0xff] }
 0x115   : > { %v713_v25 = vsub.f32 0.0, %v697_v21  ;;  %v714_v26 = vsub.f32 0.0, %v698_v22  ;;  %v693_v35 = vand.u32 2147483647, %v2289_v29  ;;  %v694_v36 = vand.u32 2147483647, %v2292_v31 }
 0x116   : > { %v711_v33 = vsub.f32 0.0, %v695_v27  ;;  %v712_v34 = vsub.f32 0.0, %v696_v28  ;;  %v2300_v40 = vld [vmem:[%s2188_s19 + $0xc8] sm:$0xff]  ;;  %v691_v43 = vand.u32 2147483647, %v2297_v37  ;;  %v681_v47 = vmax.f32 %v2273_v19, 0.0 }
 0x117   : > { %v743_v30 = vmul.f32 1.442695, %v713_v25  ;;  %v745_v32 = vmul.f32 1.442695, %v714_v26  ;;  %v709_v41 = vsub.f32 0.0, %v693_v35  ;;  %v710_v42 = vsub.f32 0.0, %v694_v36 }
 0x118   : > { %v739_v38 = vmul.f32 1.442695, %v711_v33  ;;  %v741_v39 = vmul.f32 1.442695, %v712_v34  ;;  %v692_v44 = vand.u32 2147483647, %v2300_v40 }
 0x119   : > { %1843 = vpow2.f32 %v743_v30  ;;  %v735_v45 = vmul.f32 1.442695, %v709_v41  ;;  %v737_v46 = vmul.f32 1.442695, %v710_v42  ;;  %v682_v48 = vmax.f32 %v2276_v20, 0.0  ;;  %v2308_v51 = vld [vmem:[%s2188_s19 + $0xb0] sm:$0xff] }
 0x11a   : > { %1845 = vpow2.f32 %v745_v32  ;;  %v679_v49 = vmax.f32 %v2281_v23, 0.0  ;;  %v707_v50 = vsub.f32 0.0, %v691_v43  ;;  %v680_v53 = vmax.f32 %v2284_v24, 0.0  ;;  %v2313_v56 = vld [vmem:[%s2188_s19 + $0xb8] sm:$0xff]  ;;  %v661_v20 = vld [vmem:[%s2188_s19 + $0x168] sm:$0xff]  ;;  %v628_v14 = vld [vmem:[%s2188_s19 + $0x60] sm:$0xff] }
 0x11b   : > { %1847 = vpow2.f32 %v739_v38  ;;  %v677_v54 = vmax.f32 %v2289_v29, 0.0  ;;  %v708_v55 = vsub.f32 0.0, %v692_v44  ;;  %v689_v0 = vand.u32 2147483647, %v2308_v51  ;;  %v627_v29 = vld [vmem:[%s2188_s19 + $0x58] sm:$0xff] }
 0x11c   : > { %1849 = vpow2.f32 %v741_v39  ;;  %v731_v3 = vmul.f32 1.442695, %v707_v50  ;;  %v690_v4 = vand.u32 2147483647, %v2313_v56  ;;  %v678_v39 = vmax.f32 %v2292_v31, 0.0 }
 0x11d   : > { %1851 = vpow2.f32 %v735_v45  ;;  %v733_v12 = vmul.f32 1.442695, %v708_v55 }
 0x11e   : > { %1853 = vpow2.f32 %v737_v46  ;;  %v662_v46 = vld [vmem:[%s2188_s19 + $0x170] sm:$0xff] }
 0x11f   : > { %v1844_v52 = vpop.eup %1843 }
 0x120   : > { %v1846_v57 = vpop.eup %1845  ;;  %v873_v58 = vadd.f32 1.0, %v1844_v52  ;;  %v876_v59 = vmul.f32 -0.5, %v1844_v52  ;;  %v879_v60 = vand.u32 2147483647, %v1844_v52 }
 0x121   : > { %v882_v61 = vadd.f32 1.0, %v1846_v57  ;;  %v885_v62 = vmul.f32 -0.5, %v1846_v57  ;;  %v888_v63 = vand.u32 2147483647, %v1846_v57  ;;  %v1848_v1 = vpop.eup %1847 }
 0x122   : > { %1855 = vlog2.f32 %v873_v58  ;;  %v877_v2 = vadd.f32 1.0, %v876_v59  ;;  %v1850_v5 = vpop.eup %1849  ;;  %vm2317_vm4 = vcmp.lt.f32.partialorder %v879_v60, 0.0004427343  ;;  %v855_v8 = vadd.f32 1.0, %v1848_v1 }
 0x123   : > { %1857 = vlog2.f32 %v882_v61  ;;  %v886_v7 = vadd.f32 1.0, %v885_v62  ;;  %v858_v9 = vmul.f32 -0.5, %v1848_v1  ;;  %v861_v10 = vand.u32 2147483647, %v1848_v1  ;;  %v1852_v13 = vpop.eup %1851  ;;  %v630_v62 = vld [vmem:[%s2188_s19 + $0x70] sm:$0xff] }
 0x124   : > { %v864_v11 = vadd.f32 1.0, %v1850_v5  ;;  %vm2321_vm5 = vcmp.lt.f32.partialorder %v888_v63, 0.0004427343  ;;  %1859 = vlog2.f32 %v855_v8  ;;  %v867_v15 = vmul.f32 -0.5, %v1850_v5  ;;  %v1854_v17 = vpop.eup %1853 }
 0x125   : > { %v870_v16 = vand.u32 2147483647, %v1850_v5  ;;  %v878_v18 = vmul.f32 %v1844_v52, %v877_v2  ;;  %v859_v21 = vadd.f32 1.0, %v858_v9  ;;  %v837_v22 = vadd.f32 1.0, %v1852_v13 }
 0x126   : > { %1861 = vlog2.f32 %v864_v11  ;;  %v887_v25 = vmul.f32 %v1846_v57, %v886_v7  ;;  %v868_v26 = vadd.f32 1.0, %v867_v15  ;;  %v840_v27 = vmul.f32 -0.5, %v1852_v13  ;;  %v663_v57 = vld [vmem:[%s2188_s19 + $0x178] sm:$0xff]  ;;  %v660_v7 = vld [vmem:[%s2188_s19 + $0x160] sm:$0xff] }
 0x127   : > { %v843_v28 = vand.u32 2147483647, %v1852_v13  ;;  %vm2325_vm6 = vcmp.lt.f32.partialorder %v861_v10, 0.0004427343  ;;  %1863 = vlog2.f32 %v837_v22  ;;  %v846_v33 = vadd.f32 1.0, %v1854_v17 }
 0x128   : > { %v1856_v30 = vpop.eup %1855  ;;  %v849_v34 = vmul.f32 -0.5, %v1854_v17  ;;  %vm2329_vm7 = vcmp.lt.f32.partialorder %v870_v16, 0.0004427343  ;;  %v841_v41 = vadd.f32 1.0, %v840_v27  ;;  %v860_v43 = vmul.f32 %v1848_v1, %v859_v21  ;;  %v658_v21 = vld [vmem:[%s2188_s19 + $0x150] sm:$0xff] }
 0x129   : > { %v1858_v35 = vpop.eup %1857  ;;  %v875_v36 = vmul.f32 0.6931472, %v1856_v30  ;;  %1865 = vlog2.f32 %v846_v33  ;;  %v869_v52 = vmul.f32 %v1850_v5, %v868_v26  ;;  %vm2337_vm8 = vcmp.lt.f32.partialorder %v843_v28, 0.0004427343  ;;  %v631_v5 = vld [vmem:[%s2188_s19 + $0x78] sm:$0xff]  ;;  %v2376_v28 = vld [vmem:[%s2188_s19 + $0xa0] sm:$0xff] }
 0x12a   : > { %v884_v42 = vmul.f32 0.6931472, %v1858_v35  ;;  %v850_v44 = vadd.f32 1.0, %v849_v34  ;;  %v1860_v45 = vpop.eup %1859  ;;  %1867 = vpow2.f32 %v731_v3  ;;  %v852_v61 = vand.u32 2147483647, %v1854_v17  ;;  %v626_v33 = vld [vmem:[%s2188_s19 + $0x50] sm:$0xff] }
 0x12b   : > { %v881_v50 = vsel %vm2317_vm4, %v878_v18, %v875_v36  ;;  %v857_v60 = vmul.f32 0.6931472, %v1860_v45  ;;  %v842_v2 = vmul.f32 %v1852_v13, %v841_v41  ;;  %1869 = vpow2.f32 %v733_v12  ;;  %v659_v34 = vld [vmem:[%s2188_s19 + $0x158] sm:$0xff] }
 0x12c   : > { %v1862_v31 = vpop.eup %1861  ;;  %v890_v58 = vsel %vm2321_vm5, %v887_v25, %v884_v42  ;;  %v905_v59 = vadd.f32 %v881_v50, %v681_v47  ;;  %v851_v19 = vmul.f32 %v1854_v17, %v850_v44  ;;  %v705_v47 = vsub.f32 0.0, %v689_v0 }
 0x12d   : > { %v906_v63 = vadd.f32 %v890_v58, %v682_v48  ;;  %v866_v1 = vmul.f32 0.6931472, %v1862_v31  ;;  %v1864_v3 = vpop.eup %1863  ;;  %v863_v8 = vsel %vm2325_vm6, %v860_v43, %v857_v60  ;;  %vm2363_vm9 = vcmp.lt.f32.partialorder %v852_v61, 0.0004427343  ;;  %v2385_v31 = vld [vmem:[%s2188_s19 + $0xa8] sm:$0xff] }
 0x12e   : > { %v921_v6 = vmul.f32 %v905_v59, %v662_v46  ;;  %v903_v10 = vadd.f32 %v863_v8, %v679_v49  ;;  %v839_v11 = vmul.f32 0.6931472, %v1864_v3  ;;  %v706_v0 = vsub.f32 0.0, %v690_v4  ;;  %v629_v49 = vld [vmem:[%s2188_s19 + $0x68] sm:$0xff]  ;;  %v2388_v59 = vld [vmem:[%s2188_s19 + $0x90] sm:$0xff] }
 0x12f   : > { %v922_v9 = vmul.f32 %v906_v63, %v663_v57  ;;  %v872_v48 = vsel %vm2329_vm7, %v869_v52, %v866_v1  ;;  %v1866_v12 = vpop.eup %1865  ;;  %v727_v36 = vmul.f32 1.442695, %v705_v47  ;;  %v687_v45 = vand.u32 2147483647, %v2376_v28  ;;  %v656_v47 = vld [vmem:[%s2188_s19 + $0x140] sm:$0xff] }
 0x130   : > { %v937_v13 = vadd.f32 %v921_v6, %v630_v62  ;;  %v904_v15 = vadd.f32 %v872_v48, %v680_v53  ;;  %v1868_v17 = vpop.eup %1867  ;;  %v919_v18 = vmul.f32 %v903_v10, %v660_v7  ;;  %v845_v22 = vsel %vm2337_vm8, %v842_v2, %v839_v11  ;;  %v2397_v6 = vld [vmem:[%s2188_s19 + $0x98] sm:$0xff] }
 0x131   : > { %v938_v23 = vadd.f32 %v922_v9, %v631_v5  ;;  %v848_v25 = vmul.f32 0.6931472, %v1866_v12  ;;  %v901_v53 = vadd.f32 %v845_v22, %v677_v54  ;;  %v819_v26 = vadd.f32 1.0, %v1868_v17  ;;  %v1870_v4 = vpop.eup %1869 }
 0x132   : > { %v920_v24 = vmul.f32 %v904_v15, %v661_v20  ;;  %v822_v27 = vmul.f32 -0.5, %v1868_v17  ;;  %v935_v32 = vadd.f32 %v919_v18, %v628_v14  ;;  %v828_v43 = vadd.f32 1.0, %v1870_v4 }
 0x133   : > { %v971_v30 = vpack.c.bf16 %v938_v23, %v937_v13  ;;  %v854_v35 = vsel %vm2363_vm9, %v851_v19, %v848_v25  ;;  %v917_v42 = vmul.f32 %v901_v53, %v658_v21  ;;  %1871 = vlog2.f32 %v819_v26  ;;  %v657_v21 = vld [vmem:[%s2188_s19 + $0x148] sm:$0xff] }
 0x134   : > { %v936_v38 = vadd.f32 %v920_v24, %v629_v49  ;;  %v902_v41 = vadd.f32 %v854_v35, %v678_v39  ;;  %v823_v54 = vadd.f32 1.0, %v822_v27  ;;  %v831_v44 = vmul.f32 -0.5, %v1870_v4 }
 0x135   : > { %975 = vmatpush.bf16.msra.mxu0 %v971_v30  ;;  %1706 = vmatpush.bf16.msra.mxu1 %v971_v30  ;;  %v933_v52 = vadd.f32 %v917_v42, %v626_v33  ;;  %v825_v55 = vand.u32 2147483647, %v1868_v17  ;;  %1873 = vlog2.f32 %v828_v43  ;;  %v729_v39 = vmul.f32 1.442695, %v706_v0  ;;  %v625_v33 = vld [vmem:[%s2188_s19 + $0x48] sm:$0xff] }
 0x136   : > { %1707 = vmatpush.bf16.msra.mxu2 %v971_v30  ;;  %1708 = vmatpush.bf16.msra.mxu3 %v971_v30  ;;  %v970_v46 = vpack.c.bf16 %v936_v38, %v935_v32  ;;  %v918_v50 = vmul.f32 %v902_v41, %v659_v34  ;;  %v832_v58 = vadd.f32 1.0, %v831_v44  ;;  %1875 = vpow2.f32 %v727_v36  ;;  %v2415_v30 = vld [vmem:[%s2188_s19 + $0x80] sm:$0xff]  ;;  %v2418_v32 = vld [vmem:[%s2188_s19 + $0x88] sm:$0xff] }
 0x137   : > { %v824_v60 = vmul.f32 %v1868_v17, %v823_v54  ;;  %v834_v61 = vand.u32 2147483647, %v1870_v4  ;;  %1877 = vpow2.f32 %v729_v39  ;;  %v688_v62 = vand.u32 2147483647, %v2385_v31  ;;  %v624_v17 = vld [vmem:[%s2188_s19 + $0x40] sm:$0xff] }
 0x138   : > { %v934_v57 = vadd.f32 %v918_v50, %v627_v29  ;;  %v675_v2 = vmax.f32 %v2297_v37, 0.0  ;;  %vm2392_vm10 = vcmp.lt.f32.partialorder %v825_v55, 0.0004427343  ;;  %v703_v5 = vsub.f32 0.0, %v687_v45 }
 0x139   : > { %976 = vmatpush.bf16.msra.mxu0 %v970_v46  ;;  %1709 = vmatpush.bf16.msra.mxu1 %v970_v46  ;;  %v1872_v63 = vpop.eup %1871  ;;  %v704_v8 = vsub.f32 0.0, %v688_v62  ;;  %v685_v19 = vand.u32 2147483647, %v2388_v59  ;;  %v676_v9 = vmax.f32 %v2300_v40, 0.0  ;;  %v833_v20 = vmul.f32 %v1870_v4, %v832_v58  ;;  %v602_v62 = vld [vmem:[#allocation2 + $0x58] sm:$0xff] }
 0x13a   : > { %1710 = vmatpush.bf16.msra.mxu2 %v970_v46  ;;  %1711 = vmatpush.bf16.msra.mxu3 %v970_v46  ;;  %v969_v1 = vpack.c.bf16 %v934_v57, %v933_v52  ;;  %v821_v7 = vmul.f32 0.6931472, %v1872_v63  ;;  %v723_v48 = vmul.f32 1.442695, %v703_v5  ;;  %vm2404_vm11 = vcmp.lt.f32.partialorder %v834_v61, 0.0004427343 }
 0x13b   : > { %v1874_v10 = vpop.eup %1873  ;;  %v725_v12 = vmul.f32 1.442695, %v704_v8  ;;  %v686_v13 = vand.u32 2147483647, %v2397_v6  ;;  %v701_v16 = vsub.f32 0.0, %v685_v19  ;;  %v673_v27 = vmax.f32 %v2308_v51, 0.0 }
 0x13c   : > { %v827_v37 = vsel %vm2392_vm10, %v824_v60, %v821_v7  ;;  %v1876_v14 = vpop.eup %1875  ;;  %v830_v40 = vmul.f32 0.6931472, %v1874_v10  ;;  %1879 = vpow2.f32 %v723_v48  ;;  %v674_v35 = vmax.f32 %v2313_v56, 0.0  ;;  %v654_v19 = vld [vmem:[%s2188_s19 + $0x130] sm:$0xff]  ;;  %v655_v48 = vld [vmem:[%s2188_s19 + $0x138] sm:$0xff] }
 0x13d   : > { %977 = vmatpush.bf16.msra.mxu0 %v969_v1  ;;  %1712 = vmatpush.bf16.msra.mxu1 %v969_v1  ;;  %v899_v15 = vadd.f32 %v827_v37, %v675_v2  ;;  %v1878_v0 = vpop.eup %1877  ;;  %v801_v23 = vadd.f32 1.0, %v1876_v14  ;;  %v804_v49 = vmul.f32 -0.5, %v1876_v14  ;;  %v807_v18 = vand.u32 2147483647, %v1876_v14 }
 0x13e   : > { %1713 = vmatpush.bf16.msra.mxu2 %v969_v1  ;;  %1714 = vmatpush.bf16.msra.mxu3 %v969_v1  ;;  %1881 = vpow2.f32 %v725_v12  ;;  %v836_v22 = vsel %vm2404_vm11, %v833_v20, %v830_v40  ;;  %v810_v24 = vadd.f32 1.0, %v1878_v0  ;;  %v813_v53 = vmul.f32 -0.5, %v1878_v0 }
 0x13f   : > { %v915_v25 = vmul.f32 %v899_v15, %v656_v47  ;;  %v900_v26 = vadd.f32 %v836_v22, %v676_v9  ;;  %1883 = vlog2.f32 %v801_v23  ;;  %v702_v4 = vsub.f32 0.0, %v686_v13 }
 0x140   : > { %v805_v36 = vadd.f32 1.0, %v804_v49  ;;  %1885 = vlog2.f32 %v810_v24  ;;  %v814_v41 = vadd.f32 1.0, %v813_v53  ;;  %v816_v42 = vand.u32 2147483647, %v1878_v0 }
 0x141   : > { %v931_v34 = vadd.f32 %v915_v25, %v624_v17  ;;  %v916_v38 = vmul.f32 %v900_v26, %v657_v21  ;;  %v719_v29 = vmul.f32 1.442695, %v701_v16  ;;  %vm2422_vm12 = vcmp.lt.f32.partialorder %v807_v18, 0.0004427343 }
 0x142   : > { %v1880_v54 = vpop.eup %1879  ;;  %v683_v51 = vand.u32 2147483647, %v2415_v30  ;;  %v684_v44 = vand.u32 2147483647, %v2418_v32  ;;  %v721_v56 = vmul.f32 1.442695, %v702_v4  ;;  %v806_v55 = vmul.f32 %v1876_v14, %v805_v36 }
 0x143   : > { %v932_v46 = vadd.f32 %v916_v38, %v625_v33  ;;  %v783_v50 = vadd.f32 1.0, %v1880_v54  ;;  %v786_v52 = vmul.f32 -0.5, %v1880_v54  ;;  %1887 = vpow2.f32 %v719_v29  ;;  %v622_v14 = vld [vmem:[%s2188_s19 + $0x30] sm:$0xff] }
 0x144   : > { %v1882_v45 = vpop.eup %1881  ;;  %v815_v61 = vmul.f32 %v1878_v0, %v814_v41  ;;  %vm2428_vm13 = vcmp.lt.f32.partialorder %v816_v42, 0.0004427343  ;;  %v789_v3 = vand.u32 2147483647, %v1880_v54  ;;  %v699_v8 = vsub.f32 0.0, %v683_v51  ;;  %v653_v41 = vld [vmem:[%s2188_s19 + $0x128] sm:$0xff] }
 0x145   : > { %v792_v39 = vadd.f32 1.0, %v1882_v45  ;;  %v795_v57 = vmul.f32 -0.5, %v1882_v45  ;;  %v1884_v58 = vpop.eup %1883  ;;  %v968_v60 = vpack.c.bf16 %v932_v46, %v931_v34  ;;  %1889 = vlog2.f32 %v783_v50  ;;  %v652_v34 = vld [vmem:[%s2188_s19 + $0x120] sm:$0xff]  ;;  %v621_v46 = vld [vmem:[%s2188_s19 + $0x28] sm:$0xff] }
 0x146   : > { %v1886_v63 = vpop.eup %1885  ;;  %v803_v1 = vmul.f32 0.6931472, %v1884_v58  ;;  %v787_v2 = vadd.f32 1.0, %v786_v52  ;;  %v671_v9 = vmax.f32 %v2376_v28, 0.0  ;;  %v798_v20 = vand.u32 2147483647, %v1882_v45 }
 0x147   : > { %1891 = vlog2.f32 %v792_v39  ;;  %978 = vmatpush.bf16.msra.mxu0 %v968_v60  ;;  %1715 = vmatpush.bf16.msra.mxu1 %v968_v60  ;;  %v812_v5 = vmul.f32 0.6931472, %v1886_v63  ;;  %v796_v7 = vadd.f32 1.0, %v795_v57  ;;  %v700_v11 = vsub.f32 0.0, %v684_v44  ;;  %v623_v28 = vld [vmem:[%s2188_s19 + $0x38] sm:$0xff]  ;;  %v620_v44 = vld [vmem:[%s2188_s19 + $0x20] sm:$0xff] }
 0x148   : > { %1893 = vpow2.f32 %v721_v56  ;;  %1716 = vmatpush.bf16.msra.mxu2 %v968_v60  ;;  %1717 = vmatpush.bf16.msra.mxu3 %v968_v60  ;;  %v809_v47 = vsel %vm2422_vm12, %v806_v55, %v803_v1  ;;  %v715_v12 = vmul.f32 1.442695, %v699_v8  ;;  %v672_v15 = vmax.f32 %v2385_v31, 0.0 }
 0x149   : > { %v818_v10 = vsel %vm2428_vm13, %v815_v61, %v812_v5  ;;  %v897_v37 = vadd.f32 %v809_v47, %v673_v27  ;;  %v1888_v13 = vpop.eup %1887  ;;  %v788_v16 = vmul.f32 %v1880_v54, %v787_v2  ;;  %vm2441_vm14 = vcmp.lt.f32.partialorder %v789_v3, 0.0004427343 }
 0x14a   : > { %v898_v40 = vadd.f32 %v818_v10, %v674_v35  ;;  %v797_v49 = vmul.f32 %v1882_v45, %v796_v7  ;;  %v765_v18 = vadd.f32 1.0, %v1888_v13  ;;  %v768_v21 = vmul.f32 -0.5, %v1888_v13 }
 0x14b   : > { %v1890_v17 = vpop.eup %1889  ;;  %v913_v23 = vmul.f32 %v897_v37, %v654_v19  ;;  %vm2446_vm15 = vcmp.lt.f32.partialorder %v798_v20, 0.0004427343  ;;  %1895 = vpow2.f32 %v715_v12  ;;  %v717_v4 = vmul.f32 1.442695, %v700_v11  ;;  %v650_v19 = vld [vmem:[%s2188_s19 + $0x110] sm:$0xff] }
 0x14c   : > { %v914_v25 = vmul.f32 %v898_v40, %v655_v48  ;;  %v785_v24 = vmul.f32 0.6931472, %v1890_v17  ;;  %1897 = vlog2.f32 %v765_v18  ;;  %v769_v36 = vadd.f32 1.0, %v768_v21 }
 0x14d   : > { %v1892_v22 = vpop.eup %1891  ;;  %v929_v26 = vadd.f32 %v913_v23, %v622_v14  ;;  %v771_v54 = vand.u32 2147483647, %v1888_v13  ;;  %v669_v39 = vmax.f32 %v2388_v59, 0.0  ;;  %v670_v5 = vmax.f32 %v2397_v6, 0.0  ;;  %v651_v14 = vld [vmem:[%s2188_s19 + $0x118] sm:$0xff] }
 0x14e   : > { %v1894_v31 = vpop.eup %1893  ;;  %v794_v27 = vmul.f32 0.6931472, %v1892_v22  ;;  %v930_v33 = vadd.f32 %v914_v25, %v623_v28  ;;  %v791_v35 = vsel %vm2441_vm14, %v788_v16, %v785_v24  ;;  %v770_v57 = vmul.f32 %v1888_v13, %v769_v36  ;;  %v618_v13 = vld [vmem:[%s2188_s19 + $0x10] sm:$0xff]  ;;  %v619_v28 = vld [vmem:[%s2188_s19 + $0x18] sm:$0xff]  ;;  %v616_v36 = vld [vmem:[%s2188_s19] sm:$0xff] }
 0x14f   : > { %v774_v38 = vadd.f32 1.0, %v1894_v31  ;;  %v895_v29 = vadd.f32 %v791_v35, %v671_v9  ;;  %v777_v43 = vmul.f32 -0.5, %v1894_v31  ;;  %v780_v58 = vand.u32 2147483647, %v1894_v31 }
 0x150   : > { %v800_v42 = vsel %vm2446_vm15, %v797_v49, %v794_v27  ;;  %v967_v51 = vpack.c.bf16 %v930_v33, %v929_v26  ;;  %vm2459_vm0 = vcmp.lt.f32.partialorder %v771_v54, 0.0004427343  ;;  %v667_v23 = vmax.f32 %v2415_v30, 0.0 }
 0x151   : > { %v896_v45 = vadd.f32 %v800_v42, %v672_v15  ;;  %1899 = vlog2.f32 %v774_v38  ;;  %v911_v50 = vmul.f32 %v895_v29, %v652_v34  ;;  %v778_v52 = vadd.f32 1.0, %v777_v43  ;;  %v1896_v56 = vpop.eup %1895  ;;  %v649_v38 = vld [vmem:[%s2188_s19 + $0x108] sm:$0xff] }
 0x152   : > { %1901 = vpow2.f32 %v717_v4  ;;  %979 = vmatpush.bf16.msra.mxu0 %v967_v51  ;;  %1718 = vmatpush.bf16.msra.mxu1 %v967_v51  ;;  %v1898_v60 = vpop.eup %1897  ;;  %v747_v63 = vadd.f32 1.0, %v1896_v56  ;;  %v750_v1 = vmul.f32 -0.5, %v1896_v56  ;;  %vm2467_vm1 = vcmp.lt.f32.partialorder %v780_v58, 0.0004427343  ;;  %v617_v29 = vld [vmem:[%s2188_s19 + $0x8] sm:$0xff] }
 0x153   : > { %v912_v55 = vmul.f32 %v896_v45, %v653_v41  ;;  %1719 = vmatpush.bf16.msra.mxu2 %v967_v51  ;;  %1720 = vmatpush.bf16.msra.mxu3 %v967_v51  ;;  %v927_v61 = vadd.f32 %v911_v50, %v620_v44  ;;  %v767_v3 = vmul.f32 0.6931472, %v1898_v60  ;;  %v779_v7 = vmul.f32 %v1894_v31, %v778_v52  ;;  %v648_v31 = vld [vmem:[%s2188_s19 + $0x100] sm:$0xff]  ;;  %v600_v51 = vld [vmem:[#allocation2 + $0x30] sm:$0xff]  ;;  %v605_v50 = vld [vmem:[#allocation2 + $0x68] sm:$0xff] }
 0x154   : > { %1903 = vlog2.f32 %v747_v63  ;;  %v751_v20 = vadd.f32 1.0, %v750_v1  ;;  %v753_v6 = vand.u32 2147483647, %v1896_v56  ;;  %v668_v34 = vmax.f32 %v2418_v32, 0.0  ;;  %v601_v44 = vld [vmem:[#allocation2] sm:$0xff]  ;;  %v603_v63 = vld [vmem:[#allocation2 + $0x18] sm:$0xff] }
 0x155   : > { %v928_v2 = vadd.f32 %v912_v55, %v621_v46  ;;  %v773_v47 = vsel %vm2459_vm0, %v770_v57, %v767_v3  ;;  %v604_v46 = vld [vmem:[#allocation2 + $0x50] sm:$0xff]  ;;  %v608_v32 = vld [vmem:[#allocation2 + $0x40] sm:$0xff]  ;;  %v956_v57 = vpack.c.bf16 %v601_v44, %v600_v51  ;;  %v606_v1 = vld [vmem:[#allocation2 + $0x8] sm:$0xff] }
 0x156   : > { %v893_v37 = vadd.f32 %v773_v47, %v669_v39  ;;  %v752_v0 = vmul.f32 %v1896_v56, %v751_v20  ;;  %vm754_vm2 = vcmp.lt.f32.partialorder %v753_v6, 0.0004427343  ;;  %v609_v52 = vld [vmem:[#allocation2 + $0x20] sm:$0xff]  ;;  %v613_v55 = vld [vmem:[#allocation2 + $0x70] sm:$0xff]  ;;  %v958_v58 = vpack.c.bf16 %v605_v50, %v604_v46 }
 0x157   : > { %v1900_v59 = vpop.eup %1899  ;;  %v966_v8 = vpack.c.bf16 %v928_v2, %v927_v61  ;;  %v612_v56 = vld [vmem:[#allocation2 + $0x60] sm:$0xff]  ;;  %v960_v60 = vpack.c.bf16 %v609_v52, %v608_v32  ;;  %v607_v2 = vld [vmem:[#allocation2 + $0x48] sm:$0xff]  ;;  %v610_v3 = vld [vmem:[#allocation2 + $0x10] sm:$0xff] }
 0x158   : > { %v1902_v48 = vpop.eup %1901  ;;  %v776_v10 = vmul.f32 0.6931472, %v1900_v59  ;;  %v909_v15 = vmul.f32 %v893_v37, %v650_v19  ;;  %v962_v61 = vpack.c.bf16 %v613_v55, %v612_v56  ;;  %v615_v59 = vld [vmem:[#allocation2 + $0x28] sm:$0xff]  ;;  %v959_v19 = vpack.c.bf16 %v607_v2, %v606_v1  ;;  %v665_v20 = vld [vmem:[%s2205_s16 + $0x1] sm:$0x1] }
 0x159   : > { %980 = vmatpush.bf16.msra.mxu0 %v966_v8  ;;  %1721 = vmatpush.bf16.msra.mxu1 %v966_v8  ;;  %v756_v11 = vadd.f32 1.0, %v1902_v48  ;;  %v759_v12 = vmul.f32 -0.5, %v1902_v48  ;;  %v762_v25 = vand.u32 2147483647, %v1902_v48 }
 0x15a   : > { %1722 = vmatpush.bf16.msra.mxu2 %v966_v8  ;;  %1723 = vmatpush.bf16.msra.mxu3 %v966_v8  ;;  %v782_v40 = vsel %vm2467_vm1, %v779_v7, %v776_v10  ;;  %v1904_v17 = vpop.eup %1903  ;;  %v925_v21 = vadd.f32 %v909_v15, %v618_v13  ;;  %v614_v7 = vld [vmem:[#allocation2 + $0x78] sm:$0xff]  ;;  %v957_v8 = vpack.c.bf16 %v603_v63, %v602_v62 }
 0x15b   : > { %v894_v16 = vadd.f32 %v782_v40, %v670_v5  ;;  %1905 = vlog2.f32 %v756_v11  ;;  %v760_v49 = vadd.f32 1.0, %v759_v12  ;;  %v749_v22 = vmul.f32 0.6931472, %v1904_v17  ;;  %v611_v5 = vld [vmem:[#allocation2 + $0x38] sm:$0xff] }
 0x15c   : > { %vm763_vm3 = vcmp.lt.f32.partialorder %v762_v25, 0.0004427343  ;;  %v961_v47 = vpack.c.bf16 %v611_v5, %v610_v3  ;;  %v963_v9 = vpack.c.bf16 %v615_v59, %v614_v7 }
 0x15d   : > { %v910_v18 = vmul.f32 %v894_v16, %v651_v14  ;;  %v755_v53 = vsel %vm754_vm2, %v752_v0, %v749_v22  ;;  %v761_v26 = vmul.f32 %v1902_v48, %v760_v49  ;;  %v940_v48 = vand.u32 2147483647, %v665_v20 }
 0x15e   : > { %v891_v27 = vadd.f32 %v755_v53, %v667_v23  ;;  %v939_v0 = vmax.f32 %v665_v20, 0.0  ;;  %v666_v23 = vld [vmem:[%s2205_s16 + $0x2] sm:$0x1] }
 0x15f   : > { %v926_v24 = vadd.f32 %v910_v18, %v619_v28  ;;  %v941_v10 = vsub.f32 0.0, %v940_v48  ;;  %v664_v18 = vld [vmem:[%s2205_s16] sm:$0x1] }
 0x160   : > { %v907_v35 = vmul.f32 %v891_v27, %v648_v31 }
 0x161   : > { %v1906_v4 = vpop.eup %1905  ;;  %v965_v33 = vpack.c.bf16 %v926_v24, %v925_v21  ;;  %v942_v37 = vmul.f32 1.442695, %v941_v10 }
 0x162   : > { %v758_v30 = vmul.f32 0.6931472, %v1906_v4  ;;  %v923_v43 = vadd.f32 %v907_v35, %v616_v36 }
 0x163   : > { %981 = vmatpush.bf16.msra.mxu0 %v965_v33  ;;  %1724 = vmatpush.bf16.msra.mxu1 %v965_v33  ;;  %1907 = vpow2.f32 %v942_v37 }
 0x164   : > { %1725 = vmatpush.bf16.msra.mxu2 %v965_v33  ;;  %1726 = vmatpush.bf16.msra.mxu3 %v965_v33  ;;  %v764_v41 = vsel %vm763_vm3, %v761_v26, %v758_v30 }
 0x165   : > { %v892_v42 = vadd.f32 %v764_v41, %v668_v34 }
 0x167   : > { %v908_v54 = vmul.f32 %v892_v42, %v649_v38 }
 0x169   : > { %v924_v45 = vadd.f32 %v908_v54, %v617_v29  ;;  %v1908_v6 = vpop.eup %1907 }
 0x16a   : > { %v944_v11 = vadd.f32 1.0, %v1908_v6  ;;  %v947_v12 = vmul.f32 -0.5, %v1908_v6  ;;  %v950_v40 = vand.u32 2147483647, %v1908_v6 }
 0x16b   : > { %v964_v39 = vpack.c.bf16 %v924_v45, %v923_v43 }
 0x16c   : > { %1909 = vlog2.f32 %v944_v11  ;;  %v948_v13 = vadd.f32 1.0, %v947_v12  ;;  %vm951_vm4 = vcmp.lt.f32.partialorder %v950_v40, 0.0004427343 }
 0x16d   : > { %982 = vmatpush.bf16.msra.mxu0 %v964_v39  ;;  %1727 = vmatpush.bf16.msra.mxu1 %v964_v39 }
 0x16e   : > { %1728 = vmatpush.bf16.msra.mxu2 %v964_v39  ;;  %1729 = vmatpush.bf16.msra.mxu3 %v964_v39  ;;  %v949_v16 = vmul.f32 %v1908_v6, %v948_v13 }
 0x170   : > { %983 = vmatmul.bf16.vlgmr.msra.gmra.mxu0 %v956_v57  ;;  %993 = vmatmul.bf16.vlgmr.msra.gmra.mxu1 %v958_v58 }
 0x171   : > { %1003 = vmatmul.bf16.vlgmr.msra.gmra.mxu2 %v960_v60  ;;  %1013 = vmatmul.bf16.vlgmr.msra.gmra.mxu3 %v962_v61 }
 0x172   : > { %v1910_v14 = vpop.eup %1909 }
 0x173   : > { %v946_v15 = vmul.f32 0.6931472, %v1910_v14 }
 0x175   : > { %v952_v17 = vsel %vm951_vm4, %v949_v16, %v946_v15 }
 0x176   : > { %v953_v28 = vadd.f32 %v952_v17, %v939_v0 }
 0x178   : > { %v954_v49 = vmul.f32 %v953_v28, %v666_v23 }
 0x17a   : > { %v955_v21 = vadd.f32 %v954_v49, %v664_v18 }
 0x17c   : > { %v973_v22 = vperm.slane %v955_v21, 0 }
 0x180   : > { %988 = vmatmul.bf16.gmra.mxu0 %v957_v8  ;;  %998 = vmatmul.bf16.gmra.mxu1 %v959_v19 }
 0x181   : > { %1008 = vmatmul.bf16.gmra.mxu2 %v961_v47  ;;  %1018 = vmatmul.bf16.gmra.mxu3 %v963_v9 }
 0x1ed   : > { %v984_v25 = vpop.f32.mrf.mxu0  ;;  %v994_v24 = vpop.f32.mrf.mxu1 }
 0x1ee   : > { %v2485_v53 = vadd.f32 %v984_v25, %v973_v22  ;;  %v2487_v31 = vadd.f32 %v994_v24, %v973_v22 }
 0x1f4   : > { %v1004_v26 = vpop.f32.mrf.mxu2  ;;  %v1014_v27 = vpop.f32.mrf.mxu3 }
 0x1f5   : > { %v2489_v4 = vadd.f32 %v1004_v26, %v973_v22  ;;  %v2491_v33 = vadd.f32 %v1014_v27, %v973_v22  ;;  %v986_v34 = vpop.f32.mrf.mxu0  ;;  %v996_v30 = vpop.f32.mrf.mxu1 }
 0x1f6   : > { %v987_v35 = vadd.f32 %v986_v34, %v973_v22  ;;  %v2493_v36 = vadd.f32 %v996_v30, %v973_v22 }
 0x1fc   : > { %v1006_v38 = vpop.f32.mrf.mxu2  ;;  %v1016_v41 = vpop.f32.mrf.mxu3 }
 0x1fd   : > { %v2495_v42 = vadd.f32 %v1006_v38, %v973_v22  ;;  %v2497_v29 = vadd.f32 %v1016_v41, %v973_v22  ;;  %v989_v54 = vpop.f32.mrf.mxu0  ;;  %v999_v43 = vpop.f32.mrf.mxu1 }
 0x1fe   : > { %v990_v51 = vadd.f32 %v989_v54, %v973_v22  ;;  %v2499_v44 = vadd.f32 %v999_v43, %v973_v22 }
 0x204   : > { %v1009_v45 = vpop.f32.mrf.mxu2  ;;  %v1019_v46 = vpop.f32.mrf.mxu3 }
 0x205   : > { %v2501_v50 = vadd.f32 %v1009_v45, %v973_v22  ;;  %v2503_v32 = vadd.f32 %v1019_v46, %v973_v22  ;;  %v991_v52 = vpop.f32.mrf.mxu0  ;;  %v1001_v56 = vpop.f32.mrf.mxu1 }
 0x206   : > { %v992_v55 = vadd.f32 %v991_v52, %v973_v22  ;;  %v1002_v39 = vadd.f32 %v1001_v56, %v973_v22 }
 0x209   : > { %1026 = sbr.rel (%p1697_p5) target bundleno = 544 (0x220), region = 64 }
 0x20c   : > { %v1011_v57 = vpop.f32.mrf.mxu2  ;;  %v1021_v58 = vpop.f32.mrf.mxu3 }
 0x20d   : > { %v2505_v60 = vadd.f32 %v1011_v57, %v973_v22  ;;  %v2507_v61 = vadd.f32 %v1021_v58, %v973_v22 }
 0x20e   : > { %v1027_v62 = vmax.f32 %v2485_v53, 0.0  ;;  %v1028_v63 = vmax.f32 %v987_v35, 0.0  ;;  %v1029_v1 = vmax.f32 %v990_v51, 0.0  ;;  %v1030_v2 = vmax.f32 %v992_v55, 0.0 }
 0x20f   : > { %v1031_v3 = vmax.f32 %v2487_v31, 0.0  ;;  %v1032_v5 = vmax.f32 %v2493_v36, 0.0  ;;  %v1033_v7 = vmax.f32 %v2499_v44, 0.0  ;;  %v1034_v59 = vmax.f32 %v1002_v39, 0.0 }
 0x210   : > { %1043 = vst [vmem:[#allocation2 + $0x30] sm:$0xff] %v1027_v62  ;;  %v1035_v8 = vmax.f32 %v2489_v4, 0.0  ;;  %v1036_v19 = vmax.f32 %v2495_v42, 0.0  ;;  %v1037_v47 = vmax.f32 %v2501_v50, 0.0  ;;  %v1038_v9 = vmax.f32 %v2505_v60, 0.0 }
 0x211   : > { %1044 = vst [vmem:[#allocation2] sm:$0xff] %v1028_v63  ;;  %v1039_v20 = vmax.f32 %v2491_v33, 0.0  ;;  %v1040_v48 = vmax.f32 %v2497_v29, 0.0  ;;  %v1041_v10 = vmax.f32 %v2503_v32, 0.0  ;;  %v1042_v37 = vmax.f32 %v2507_v61, 0.0 }
 0x212   : > { %1045 = vst [vmem:[#allocation2 + $0x58] sm:$0xff] %v1029_v1 }
 0x213   : > { %1046 = vst [vmem:[#allocation2 + $0x18] sm:$0xff] %v1030_v2 }
 0x214   : > { %1047 = vst [vmem:[#allocation2 + $0x50] sm:$0xff] %v1031_v3 }
 0x215   : > { %1048 = vst [vmem:[#allocation2 + $0x68] sm:$0xff] %v1032_v5 }
 0x216   : > { %1049 = vst [vmem:[#allocation2 + $0x8] sm:$0xff] %v1033_v7 }
 0x217   : > { %1050 = vst [vmem:[#allocation2 + $0x48] sm:$0xff] %v1034_v59 }
 0x218   : > { %1051 = vst [vmem:[#allocation2 + $0x40] sm:$0xff] %v1035_v8 }
 0x219   : > { %1052 = vst [vmem:[#allocation2 + $0x20] sm:$0xff] %v1036_v19 }
 0x21a   : > { %1053 = vst [vmem:[#allocation2 + $0x10] sm:$0xff] %v1037_v47 }
 0x21b   : > { %1054 = vst [vmem:[#allocation2 + $0x38] sm:$0xff] %v1038_v9 }
 0x21c   : > { %1055 = vst [vmem:[#allocation2 + $0x60] sm:$0xff] %v1039_v20 }
 0x21d   : > { %1056 = vst [vmem:[#allocation2 + $0x70] sm:$0xff] %v1040_v48 }
 0x21e   : > { %1057 = vst [vmem:[#allocation2 + $0x78] sm:$0xff] %v1041_v10 }
 0x21f   : > { %1058 = vst [vmem:[#allocation2 + $0x28] sm:$0xff] %v1042_v37 }
 0x220 PF: > { %p1699_p6 = scmp.ne.s32.totalorder %s2997_s22, 1 }
 0x222   : > { %1062 = sbr.rel (%p1699_p6) target bundleno = 572 (0x23c), region = 68 }
 0x227   : > { %v1063_v6 = vld [vmem:[#allocation3 + $0x28] sm:$0xff]  ;;  %v1065_v12 = vld [vmem:[#allocation3 + $0x10] sm:$0xff]  ;;  %v1066_v15 = vld [vmem:[#allocation3 + $0x40] sm:$0xff] }
 0x228   : > { %v1064_v11 = vld [vmem:[#allocation3 + $0x68] sm:$0xff]  ;;  %v1079_v13 = vadd.f32 %v1063_v6, %v2485_v53  ;;  %v1081_v40 = vadd.f32 %v1065_v12, %v990_v51  ;;  %v1068_v0 = vld [vmem:[#allocation3 + $0x30] sm:$0xff]  ;;  %v1082_v17 = vadd.f32 %v1066_v15, %v992_v55  ;;  %v1070_v18 = vld [vmem:[#allocation3 + $0x38] sm:$0xff] }
 0x229   : > { %v1080_v14 = vadd.f32 %v1064_v11, %v987_v35  ;;  %v1067_v16 = vld [vmem:[#allocation3 + $0x48] sm:$0xff]  ;;  %v1084_v23 = vadd.f32 %v1068_v0, %v2493_v36  ;;  %v1069_v49 = vld [vmem:[#allocation3 + $0x70] sm:$0xff]  ;;  %v1071_v21 = vld [vmem:[#allocation3 + $0x20] sm:$0xff]  ;;  %v1086_v34 = vadd.f32 %v1070_v18, %v1002_v39 }
 0x22a   : > { %v1083_v28 = vadd.f32 %v1067_v16, %v2487_v31  ;;  %v1095_v22 = vmax.f32 %v1079_v13, 0.0  ;;  %v1097_v24 = vmax.f32 %v1081_v40, 0.0  ;;  %v1085_v26 = vadd.f32 %v1069_v49, %v2499_v44  ;;  %v1072_v27 = vld [vmem:[#allocation3 + $0x78] sm:$0xff]  ;;  %v1075_v54 = vld [vmem:[#allocation3] sm:$0xff]  ;;  %v1076_v45 = vld [vmem:[#allocation3 + $0x8] sm:$0xff] }
 0x22b   : > { %v1096_v25 = vmax.f32 %v1080_v14, 0.0  ;;  %v1098_v53 = vmax.f32 %v1082_v17, 0.0  ;;  %v1073_v30 = vld [vmem:[#allocation3 + $0x18] sm:$0xff]  ;;  %v1087_v38 = vadd.f32 %v1071_v21, %v2489_v4  ;;  %v1100_v31 = vmax.f32 %v1084_v23, 0.0  ;;  %v1077_v52 = vld [vmem:[#allocation3 + $0x60] sm:$0xff]  ;;  %v1078_v55 = vld [vmem:[#allocation3 + $0x50] sm:$0xff] }
 0x22c   : > { %1111 = vst [vmem:[#allocation2 + $0x30] sm:$0xff] %v1095_v22  ;;  %v1099_v35 = vmax.f32 %v1083_v28, 0.0  ;;  %v1074_v41 = vld [vmem:[#allocation3 + $0x58] sm:$0xff]  ;;  %v1088_v36 = vadd.f32 %v1072_v27, %v2495_v42  ;;  %v1101_v43 = vmax.f32 %v1085_v26, 0.0  ;;  %v1089_v51 = vadd.f32 %v1073_v30, %v2501_v50 }
 0x22d   : > { %1112 = vst [vmem:[#allocation2] sm:$0xff] %v1096_v25  ;;  %v1102_v44 = vmax.f32 %v1086_v34, 0.0  ;;  %v1090_v46 = vadd.f32 %v1074_v41, %v2505_v60  ;;  %v1103_v56 = vmax.f32 %v1087_v38, 0.0  ;;  %v1091_v4 = vadd.f32 %v1075_v54, %v2491_v33 }
 0x22e   : > { %1113 = vst [vmem:[#allocation2 + $0x58] sm:$0xff] %v1097_v24  ;;  %v1104_v39 = vmax.f32 %v1088_v36, 0.0  ;;  %v1092_v42 = vadd.f32 %v1076_v45, %v2497_v29  ;;  %v1105_v57 = vmax.f32 %v1089_v51, 0.0  ;;  %v1093_v58 = vadd.f32 %v1077_v52, %v2503_v32 }
 0x22f   : > { %1114 = vst [vmem:[#allocation2 + $0x18] sm:$0xff] %v1098_v53  ;;  %v1106_v50 = vmax.f32 %v1090_v46, 0.0  ;;  %v1094_v62 = vadd.f32 %v1078_v55, %v2507_v61  ;;  %v1107_v60 = vmax.f32 %v1091_v4, 0.0 }
 0x230   : > { %1115 = vst [vmem:[#allocation2 + $0x50] sm:$0xff] %v1099_v35  ;;  %v1108_v63 = vmax.f32 %v1092_v42, 0.0  ;;  %v1109_v1 = vmax.f32 %v1093_v58, 0.0 }
 0x231   : > { %1116 = vst [vmem:[#allocation2 + $0x68] sm:$0xff] %v1100_v31  ;;  %v1110_v33 = vmax.f32 %v1094_v62, 0.0 }
 0x232   : > { %1117 = vst [vmem:[#allocation2 + $0x8] sm:$0xff] %v1101_v43 }
 0x233   : > { %1118 = vst [vmem:[#allocation2 + $0x48] sm:$0xff] %v1102_v44 }
 0x234   : > { %1119 = vst [vmem:[#allocation2 + $0x40] sm:$0xff] %v1103_v56 }
 0x235   : > { %1120 = vst [vmem:[#allocation2 + $0x20] sm:$0xff] %v1104_v39 }
 0x236   : > { %1121 = vst [vmem:[#allocation2 + $0x10] sm:$0xff] %v1105_v57 }
 0x237   : > { %1122 = vst [vmem:[#allocation2 + $0x38] sm:$0xff] %v1106_v50 }
 0x238   : > { %1123 = vst [vmem:[#allocation2 + $0x60] sm:$0xff] %v1107_v60 }
 0x239   : > { %1124 = vst [vmem:[#allocation2 + $0x70] sm:$0xff] %v1108_v63 }
 0x23a   : > { %1125 = vst [vmem:[#allocation2 + $0x78] sm:$0xff] %v1109_v1 }
 0x23b   : > { %1126 = vst [vmem:[#allocation2 + $0x28] sm:$0xff] %v1110_v33 }
 0x23c PF: > { %p1700_p7 = scmp.ne.s32.totalorder %s2059_s27, 3 }
 0x23e   : > { %1130 = sbr.rel (%p1700_p7) target bundleno = 833 (0x341), region = 72 }
 0x243   : > { %v2540_v29 = vld [vmem:[%s2913_s5 + $0xf0] sm:$0xff]  ;;  %v2545_v32 = vld [vmem:[%s2913_s5 + $0xf8] sm:$0xff]  ;;  %v2552_v3 = vld [vmem:[%s2913_s5 + $0xe0] sm:$0xff] }
 0x244   : > { %v1228_v61 = vand.u32 2147483647, %v2540_v29  ;;  %v1229_v2 = vand.u32 2147483647, %v2545_v32  ;;  %v2557_v5 = vld [vmem:[%s2913_s5 + $0xe8] sm:$0xff]  ;;  %v2564_v47 = vld [vmem:[%s2913_s5 + $0xd0] sm:$0xff] }
 0x245   : > { %v1226_v8 = vand.u32 2147483647, %v2552_v3  ;;  %v1227_v19 = vand.u32 2147483647, %v2557_v5  ;;  %v2569_v20 = vld [vmem:[%s2913_s5 + $0xd8] sm:$0xff]  ;;  %v2576_v12 = vld [vmem:[%s2913_s5 + $0xc0] sm:$0xff] }
 0x246   : > { %v1244_v7 = vsub.f32 0.0, %v1228_v61  ;;  %v1245_v59 = vsub.f32 0.0, %v1229_v2  ;;  %v1224_v6 = vand.u32 2147483647, %v2564_v47  ;;  %v1225_v11 = vand.u32 2147483647, %v2569_v20 }
 0x247   : > { %v1242_v10 = vsub.f32 0.0, %v1226_v8  ;;  %v1243_v37 = vsub.f32 0.0, %v1227_v19  ;;  %v2581_v40 = vld [vmem:[%s2913_s5 + $0xc8] sm:$0xff]  ;;  %v1222_v0 = vand.u32 2147483647, %v2576_v12  ;;  %v1212_v49 = vmax.f32 %v2540_v29, 0.0 }
 0x248   : > { %v1274_v9 = vmul.f32 1.442695, %v1244_v7  ;;  %v1276_v48 = vmul.f32 1.442695, %v1245_v59  ;;  %v1240_v15 = vsub.f32 0.0, %v1224_v6  ;;  %v1241_v16 = vsub.f32 0.0, %v1225_v11 }
 0x249   : > { %v1270_v13 = vmul.f32 1.442695, %v1242_v10  ;;  %v1272_v14 = vmul.f32 1.442695, %v1243_v37  ;;  %v1223_v17 = vand.u32 2147483647, %v2581_v40 }
 0x24a   : > { %1911 = vpow2.f32 %v1274_v9  ;;  %v1266_v28 = vmul.f32 1.442695, %v1240_v15  ;;  %v1268_v23 = vmul.f32 1.442695, %v1241_v16  ;;  %v1213_v18 = vmax.f32 %v2545_v32, 0.0  ;;  %v2591_v25 = vld [vmem:[%s2913_s5 + $0xb0] sm:$0xff] }
 0x24b   : > { %1913 = vpow2.f32 %v1276_v48  ;;  %v1210_v21 = vmax.f32 %v2552_v3, 0.0  ;;  %v1238_v22 = vsub.f32 0.0, %v1222_v0  ;;  %v1211_v26 = vmax.f32 %v2557_v5, 0.0  ;;  %v2598_v34 = vld [vmem:[%s2913_s5 + $0xb8] sm:$0xff]  ;;  %v1191_v29 = vld [vmem:[%s2913_s5 + $0x160] sm:$0xff] }
 0x24c   : > { %1915 = vpow2.f32 %v1270_v13  ;;  %v1208_v27 = vmax.f32 %v2564_v47, 0.0  ;;  %v1239_v53 = vsub.f32 0.0, %v1223_v17  ;;  %v1220_v43 = vand.u32 2147483647, %v2591_v25  ;;  %v1159_v62 = vld [vmem:[%s2913_s5 + $0x60] sm:$0xff] }
 0x24d   : > { %1917 = vpow2.f32 %v1272_v14  ;;  %v1262_v44 = vmul.f32 1.442695, %v1238_v22  ;;  %v1221_v46 = vand.u32 2147483647, %v2598_v34  ;;  %v1209_v14 = vmax.f32 %v2569_v20, 0.0 }
 0x24e   : > { %1919 = vpow2.f32 %v1266_v28  ;;  %v1264_v58 = vmul.f32 1.442695, %v1239_v53  ;;  %v1236_v32 = vsub.f32 0.0, %v1220_v43 }
 0x24f   : > { %1921 = vpow2.f32 %v1268_v23  ;;  %v1193_v23 = vld [vmem:[%s2913_s5 + $0x170] sm:$0xff] }
 0x250   : > { %v1912_v24 = vpop.eup %1911 }
 0x251   : > { %v1914_v30 = vpop.eup %1913  ;;  %v1404_v35 = vadd.f32 1.0, %v1912_v24  ;;  %v1407_v38 = vmul.f32 -0.5, %v1912_v24  ;;  %v1410_v41 = vand.u32 2147483647, %v1912_v24 }
 0x252   : > { %v1413_v31 = vadd.f32 1.0, %v1914_v30  ;;  %v1416_v36 = vmul.f32 -0.5, %v1914_v30  ;;  %v1419_v54 = vand.u32 2147483647, %v1914_v30  ;;  %v1916_v51 = vpop.eup %1915 }
 0x253   : > { %1923 = vlog2.f32 %v1404_v35  ;;  %v1408_v45 = vadd.f32 1.0, %v1407_v38  ;;  %v1918_v52 = vpop.eup %1917  ;;  %vm2602_vm5 = vcmp.lt.f32.partialorder %v1410_v41, 0.0004427343  ;;  %v1386_v55 = vadd.f32 1.0, %v1916_v51 }
 0x254   : > { %1925 = vlog2.f32 %v1413_v31  ;;  %v1417_v4 = vadd.f32 1.0, %v1416_v36  ;;  %v1389_v39 = vmul.f32 -0.5, %v1916_v51  ;;  %v1392_v42 = vand.u32 2147483647, %v1916_v51  ;;  %v1920_v50 = vpop.eup %1919  ;;  %v1161_v36 = vld [vmem:[%s2913_s5 + $0x70] sm:$0xff] }
 0x255   : > { %v1395_v57 = vadd.f32 1.0, %v1918_v52  ;;  %vm2606_vm6 = vcmp.lt.f32.partialorder %v1419_v54, 0.0004427343  ;;  %1927 = vlog2.f32 %v1386_v55  ;;  %v1398_v60 = vmul.f32 -0.5, %v1918_v52  ;;  %v1922_v1 = vpop.eup %1921  ;;  %v1192_v55 = vld [vmem:[%s2913_s5 + $0x168] sm:$0xff] }
 0x256   : > { %v1401_v63 = vand.u32 2147483647, %v1918_v52  ;;  %v1409_v33 = vmul.f32 %v1912_v24, %v1408_v45  ;;  %v1390_v61 = vadd.f32 1.0, %v1389_v39  ;;  %v1368_v2 = vadd.f32 1.0, %v1920_v50 }
 0x257   : > { %1929 = vlog2.f32 %v1395_v57  ;;  %v1418_v7 = vmul.f32 %v1914_v30, %v1417_v4  ;;  %v1399_v59 = vadd.f32 1.0, %v1398_v60  ;;  %v1371_v8 = vmul.f32 -0.5, %v1920_v50  ;;  %v1194_v30 = vld [vmem:[%s2913_s5 + $0x178] sm:$0xff] }
 0x258   : > { %v1374_v19 = vand.u32 2147483647, %v1920_v50  ;;  %vm2610_vm7 = vcmp.lt.f32.partialorder %v1392_v42, 0.0004427343  ;;  %1931 = vlog2.f32 %v1368_v2  ;;  %v1377_v10 = vadd.f32 1.0, %v1922_v1 }
 0x259   : > { %v1924_v9 = vpop.eup %1923  ;;  %v1380_v37 = vmul.f32 -0.5, %v1922_v1  ;;  %vm2614_vm8 = vcmp.lt.f32.partialorder %v1401_v63, 0.0004427343  ;;  %v1372_v15 = vadd.f32 1.0, %v1371_v8  ;;  %v1391_v0 = vmul.f32 %v1916_v51, %v1390_v61  ;;  %v1189_v61 = vld [vmem:[%s2913_s5 + $0x150] sm:$0xff]  ;;  %v2681_v8 = vld [vmem:[%s2913_s5 + $0xa0] sm:$0xff] }
 0x25a   : > { %v1926_v6 = vpop.eup %1925  ;;  %v1406_v11 = vmul.f32 0.6931472, %v1924_v9  ;;  %1933 = vlog2.f32 %v1377_v10  ;;  %v1400_v24 = vmul.f32 %v1918_v52, %v1399_v59  ;;  %vm2624_vm9 = vcmp.lt.f32.partialorder %v1374_v19, 0.0004427343  ;;  %v1162_v52 = vld [vmem:[%s2913_s5 + $0x78] sm:$0xff]  ;;  %v1157_v10 = vld [vmem:[%s2913_s5 + $0x50] sm:$0xff] }
 0x25b   : > { %v1415_v16 = vmul.f32 0.6931472, %v1926_v6  ;;  %v1381_v17 = vadd.f32 1.0, %v1380_v37  ;;  %v1928_v28 = vpop.eup %1927  ;;  %1935 = vpow2.f32 %v1262_v44  ;;  %v1383_v31 = vand.u32 2147483647, %v1922_v1  ;;  %v1190_v37 = vld [vmem:[%s2913_s5 + $0x158] sm:$0xff] }
 0x25c   : > { %v1412_v22 = vsel %vm2602_vm5, %v1409_v33, %v1406_v11  ;;  %v1388_v41 = vmul.f32 0.6931472, %v1928_v28  ;;  %v1373_v45 = vmul.f32 %v1920_v50, %v1372_v15  ;;  %1937 = vpow2.f32 %v1264_v58  ;;  %v1158_v15 = vld [vmem:[%s2913_s5 + $0x58] sm:$0xff] }
 0x25d   : > { %v1930_v20 = vpop.eup %1929  ;;  %v1421_v35 = vsel %vm2606_vm6, %v1418_v7, %v1415_v16  ;;  %v1436_v38 = vadd.f32 %v1412_v22, %v1212_v49  ;;  %v1382_v4 = vmul.f32 %v1922_v1, %v1381_v17  ;;  %vm2662_vm10 = vcmp.lt.f32.partialorder %v1383_v31, 0.0004427343 }
 0x25e   : > { %v1437_v54 = vadd.f32 %v1421_v35, %v1213_v18  ;;  %v1397_v51 = vmul.f32 0.6931472, %v1930_v20  ;;  %v1932_v44 = vpop.eup %1931  ;;  %v1394_v49 = vsel %vm2610_vm7, %v1391_v0, %v1388_v41  ;;  %v1237_v63 = vsub.f32 0.0, %v1221_v46 }
 0x25f   : > { %v1452_v56 = vmul.f32 %v1436_v38, %v1193_v23  ;;  %v1434_v42 = vadd.f32 %v1394_v49, %v1210_v21  ;;  %v1370_v57 = vmul.f32 0.6931472, %v1932_v44  ;;  %v1160_v21 = vld [vmem:[%s2913_s5 + $0x68] sm:$0xff]  ;;  %v1218_v28 = vand.u32 2147483647, %v2681_v8  ;;  %v2703_v38 = vld [vmem:[%s2913_s5 + $0x90] sm:$0xff] }
 0x260   : > { %v1453_v18 = vmul.f32 %v1437_v54, %v1194_v30  ;;  %v1403_v39 = vsel %vm2614_vm8, %v1400_v24, %v1397_v51  ;;  %v1934_v58 = vpop.eup %1933  ;;  %v1260_v20 = vmul.f32 1.442695, %v1237_v63  ;;  %vm1555_vm6 = vcmask 64512  }
 0x261   : > { %v1468_v50 = vadd.f32 %v1452_v56, %v1161_v36  ;;  %v1435_v43 = vadd.f32 %v1403_v39, %v1211_v26  ;;  %v1936_v1 = vpop.eup %1935  ;;  %v1450_v33 = vmul.f32 %v1434_v42, %v1191_v29  ;;  %v1376_v5 = vsel %vm2624_vm9, %v1373_v45, %v1370_v57  ;;  %v2714_v56 = vld [vmem:[%s2913_s5 + $0x98] sm:$0xff] }
 0x262   : > { %v1469_v3 = vadd.f32 %v1453_v18, %v1162_v52  ;;  %v1379_v26 = vmul.f32 0.6931472, %v1934_v58  ;;  %v1432_v7 = vadd.f32 %v1376_v5, %v1208_v27  ;;  %v1350_v46 = vadd.f32 1.0, %v1936_v1  ;;  %v1938_v19 = vpop.eup %1937 }
 0x263   : > { %v1451_v2 = vmul.f32 %v1435_v43, %v1192_v55  ;;  %v1353_v59 = vmul.f32 -0.5, %v1936_v1  ;;  %v1466_v48 = vadd.f32 %v1450_v33, %v1159_v62  ;;  %v1258_v27 = vmul.f32 1.442695, %v1236_v32  ;;  %v1187_v32 = vld [vmem:[%s2913_s5 + $0x140] sm:$0xff] }
 0x264   : > { %v1502_v9 = vpack.c.bf16 %v1469_v3, %v1468_v50  ;;  %v1385_v47 = vsel %vm2662_vm10, %v1382_v4, %v1379_v26  ;;  %v1448_v13 = vmul.f32 %v1432_v7, %v1189_v61  ;;  %1939 = vlog2.f32 %v1350_v46  ;;  %v1188_v61 = vld [vmem:[%s2913_s5 + $0x148] sm:$0xff] }
 0x265   : > { %v1467_v6 = vadd.f32 %v1451_v2, %v1160_v21  ;;  %v1433_v11 = vadd.f32 %v1385_v47, %v1209_v14  ;;  %v1354_v16 = vadd.f32 1.0, %v1353_v59  ;;  %v1359_v0 = vadd.f32 1.0, %v1938_v19  ;;  %v2698_v14 = vld [vmem:[%s2913_s5 + $0xa8] sm:$0xff] }
 0x266   : > { %1506 = vmatpush.bf16.msra.mxu0 %v1502_v9  ;;  %1730 = vmatpush.bf16.msra.mxu1 %v1502_v9  ;;  %v1362_v17 = vmul.f32 -0.5, %v1938_v19  ;;  %v1464_v24 = vadd.f32 %v1448_v13, %v1157_v10  ;;  %v1356_v53 = vand.u32 2147483647, %v1936_v1  ;;  %v1365_v31 = vand.u32 2147483647, %v1938_v19  ;;  %v1156_v10 = vld [vmem:[%s2913_s5 + $0x48] sm:$0xff] }
 0x267   : > { %1731 = vmatpush.bf16.msra.mxu2 %v1502_v9  ;;  %1732 = vmatpush.bf16.msra.mxu3 %v1502_v9  ;;  %v1501_v23 = vpack.c.bf16 %v1467_v6, %v1466_v48  ;;  %v1449_v22 = vmul.f32 %v1433_v11, %v1190_v37  ;;  %1941 = vlog2.f32 %v1359_v0  ;;  %v1355_v41 = vmul.f32 %v1936_v1, %v1354_v16  ;;  %v1155_v1 = vld [vmem:[%s2913_s5 + $0x40] sm:$0xff]  ;;  %v2745_v48 = vld [vmem:[%s2913_s5 + $0x88] sm:$0xff] }
 0x268   : > { %v1363_v35 = vadd.f32 1.0, %v1362_v17  ;;  %1943 = vpow2.f32 %v1258_v27  ;;  %v1219_v36 = vand.u32 2147483647, %v2698_v14  ;;  %v1206_v45 = vmax.f32 %v2576_v12, 0.0  ;;  %v2740_v9 = vld [vmem:[%s2913_s5 + $0x80] sm:$0xff] }
 0x269   : > { %v1465_v30 = vadd.f32 %v1449_v22, %v1158_v15  ;;  %1945 = vpow2.f32 %v1260_v20  ;;  %vm2707_vm11 = vcmp.lt.f32.partialorder %v1356_v53, 0.0004427343  ;;  %v1234_v52 = vsub.f32 0.0, %v1218_v28 }
 0x26a   : > { %1507 = vmatpush.bf16.msra.mxu0 %v1501_v23  ;;  %1733 = vmatpush.bf16.msra.mxu1 %v1501_v23  ;;  %v1940_v54 = vpop.eup %1939  ;;  %v1235_v49 = vsub.f32 0.0, %v1219_v36  ;;  %v1216_v4 = vand.u32 2147483647, %v2703_v38  ;;  %v1207_v12 = vmax.f32 %v2581_v40, 0.0  ;;  %v1364_v18 = vmul.f32 %v1938_v19, %v1363_v35  ;;  %v1133_v36 = vld [vmem:[#allocation2 + $0x58] sm:$0xff] }
 0x26b   : > { %1734 = vmatpush.bf16.msra.mxu2 %v1501_v23  ;;  %1735 = vmatpush.bf16.msra.mxu3 %v1501_v23  ;;  %v1500_v51 = vpack.c.bf16 %v1465_v30, %v1464_v24  ;;  %v1352_v29 = vmul.f32 0.6931472, %v1940_v54  ;;  %v1254_v55 = vmul.f32 1.442695, %v1234_v52  ;;  %vm2723_vm12 = vcmp.lt.f32.partialorder %v1365_v31, 0.0004427343 }
 0x26c   : > { %v1256_v58 = vmul.f32 1.442695, %v1235_v49  ;;  %v1217_v50 = vand.u32 2147483647, %v2714_v56  ;;  %v1232_v60 = vsub.f32 0.0, %v1216_v4  ;;  %v1204_v59 = vmax.f32 %v2591_v25, 0.0 }
 0x26d   : > { %v1942_v39 = vpop.eup %1941  ;;  %v1358_v42 = vsel %vm2707_vm11, %v1355_v41, %v1352_v29  ;;  %1947 = vpow2.f32 %v1254_v55  ;;  %v1205_v47 = vmax.f32 %v2598_v34, 0.0  ;;  %v1214_v0 = vand.u32 2147483647, %v2740_v9  ;;  %v1185_v4 = vld [vmem:[%s2913_s5 + $0x130] sm:$0xff]  ;;  %v1186_v55 = vld [vmem:[%s2913_s5 + $0x138] sm:$0xff] }
 0x26e   : > { %1508 = vmatpush.bf16.msra.mxu0 %v1500_v51  ;;  %1736 = vmatpush.bf16.msra.mxu1 %v1500_v51  ;;  %v1944_v62 = vpop.eup %1943  ;;  %v1361_v43 = vmul.f32 0.6931472, %v1942_v39  ;;  %v1430_v40 = vadd.f32 %v1358_v42, %v1206_v45  ;;  %1949 = vpow2.f32 %v1256_v58  ;;  %v1233_v19 = vsub.f32 0.0, %v1217_v50 }
 0x26f   : > { %1737 = vmatpush.bf16.msra.mxu2 %v1500_v51  ;;  %1738 = vmatpush.bf16.msra.mxu3 %v1500_v51  ;;  %v1946_v63 = vpop.eup %1945  ;;  %v1332_v3 = vadd.f32 1.0, %v1944_v62  ;;  %v1335_v21 = vmul.f32 -0.5, %v1944_v62  ;;  %v1338_v33 = vand.u32 2147483647, %v1944_v62  ;;  %v1250_v13 = vmul.f32 1.442695, %v1232_v60 }
 0x270   : > { %v1367_v5 = vsel %vm2723_vm12, %v1364_v18, %v1361_v43  ;;  %v1446_v26 = vmul.f32 %v1430_v40, %v1187_v32  ;;  %v1341_v2 = vadd.f32 1.0, %v1946_v63  ;;  %v1344_v7 = vmul.f32 -0.5, %v1946_v63 }
 0x271   : > { %v1431_v46 = vadd.f32 %v1367_v5, %v1207_v12  ;;  %1951 = vlog2.f32 %v1332_v3  ;;  %v1336_v25 = vadd.f32 1.0, %v1335_v21  ;;  %v1347_v11 = vand.u32 2147483647, %v1946_v63 }
 0x272   : > { %v1462_v37 = vadd.f32 %v1446_v26, %v1155_v1  ;;  %1953 = vlog2.f32 %v1341_v2  ;;  %v1345_v6 = vadd.f32 1.0, %v1344_v7  ;;  %vm2751_vm13 = vcmp.lt.f32.partialorder %v1338_v33, 0.0004427343  ;;  %v1154_v1 = vld [vmem:[%s2913_s5 + $0x38] sm:$0xff] }
 0x273   : > { %v1447_v27 = vmul.f32 %v1431_v46, %v1188_v61  ;;  %v1948_v15 = vpop.eup %1947  ;;  %v1215_v17 = vand.u32 2147483647, %v2745_v48  ;;  %v1252_v34 = vmul.f32 1.442695, %v1233_v19  ;;  %v1337_v53 = vmul.f32 %v1944_v62, %v1336_v25  ;;  %v1153_v62 = vld [vmem:[%s2913_s5 + $0x30] sm:$0xff] }
 0x274   : > { %v1950_v28 = vpop.eup %1949  ;;  %v1314_v22 = vadd.f32 1.0, %v1948_v15  ;;  %v1317_v24 = vmul.f32 -0.5, %v1948_v15  ;;  %1955 = vpow2.f32 %v1250_v13  ;;  %v1346_v31 = vmul.f32 %v1946_v63, %v1345_v6  ;;  %v1184_v6 = vld [vmem:[%s2913_s5 + $0x128] sm:$0xff] }
 0x275   : > { %v1463_v23 = vadd.f32 %v1447_v27, %v1156_v10  ;;  %v1323_v20 = vadd.f32 1.0, %v1950_v28  ;;  %v1326_v30 = vmul.f32 -0.5, %v1950_v28  ;;  %vm2757_vm14 = vcmp.lt.f32.partialorder %v1347_v11, 0.0004427343 }
 0x276   : > { %1957 = vlog2.f32 %v1314_v22  ;;  %v1318_v45 = vadd.f32 1.0, %v1317_v24  ;;  %v1320_v44 = vand.u32 2147483647, %v1948_v15  ;;  %v1230_v49 = vsub.f32 0.0, %v1214_v0 }
 0x277   : > { %v1952_v35 = vpop.eup %1951  ;;  %v1499_v41 = vpack.c.bf16 %v1463_v23, %v1462_v37  ;;  %1959 = vlog2.f32 %v1323_v20  ;;  %v1327_v29 = vadd.f32 1.0, %v1326_v30  ;;  %v1202_v12 = vmax.f32 %v2681_v8, 0.0  ;;  %v1183_v37 = vld [vmem:[%s2913_s5 + $0x120] sm:$0xff]  ;;  %v1152_v23 = vld [vmem:[%s2913_s5 + $0x28] sm:$0xff] }
 0x278   : > { %v1954_v54 = vpop.eup %1953  ;;  %v1334_v51 = vmul.f32 0.6931472, %v1952_v35  ;;  %1961 = vpow2.f32 %v1252_v34  ;;  %v1329_v18 = vand.u32 2147483647, %v1950_v28  ;;  %v1231_v57 = vsub.f32 0.0, %v1215_v17  ;;  %v1151_v17 = vld [vmem:[%s2913_s5 + $0x20] sm:$0xff] }
 0x279   : > { %1509 = vmatpush.bf16.msra.mxu0 %v1499_v41  ;;  %1739 = vmatpush.bf16.msra.mxu1 %v1499_v41  ;;  %v1343_v52 = vmul.f32 0.6931472, %v1954_v54  ;;  %v1246_v58 = vmul.f32 1.442695, %v1230_v49  ;;  %v1203_v40 = vmax.f32 %v2698_v14, 0.0  ;;  %v1319_v8 = vmul.f32 %v1948_v15, %v1318_v45 }
 0x27a   : > { %1740 = vmatpush.bf16.msra.mxu2 %v1499_v41  ;;  %1741 = vmatpush.bf16.msra.mxu3 %v1499_v41  ;;  %v1340_v32 = vsel %vm2751_vm13, %v1337_v53, %v1334_v51  ;;  %v1956_v50 = vpop.eup %1955  ;;  %vm2776_vm15 = vcmp.lt.f32.partialorder %v1320_v44, 0.0004427343  ;;  %v1328_v21 = vmul.f32 %v1950_v28, %v1327_v29  ;;  %vm2783_vm0 = vcmp.lt.f32.partialorder %v1329_v18, 0.0004427343 }
 0x27b   : > { %v1349_v39 = vsel %vm2757_vm14, %v1346_v31, %v1343_v52  ;;  %v1428_v42 = vadd.f32 %v1340_v32, %v1204_v59  ;;  %v1296_v33 = vadd.f32 1.0, %v1956_v50  ;;  %v1299_v61 = vmul.f32 -0.5, %v1956_v50 }
 0x27c   : > { %v1429_v43 = vadd.f32 %v1349_v39, %v1205_v47  ;;  %v1958_v63 = vpop.eup %1957  ;;  %1963 = vpow2.f32 %v1246_v58  ;;  %v1248_v19 = vmul.f32 1.442695, %v1231_v57  ;;  %v1302_v15 = vand.u32 2147483647, %v1956_v50 }
 0x27d   : > { %v1444_v3 = vmul.f32 %v1428_v42, %v1185_v4  ;;  %v1960_v5 = vpop.eup %1959  ;;  %v1316_v2 = vmul.f32 0.6931472, %v1958_v63  ;;  %1965 = vlog2.f32 %v1296_v33  ;;  %v1300_v25 = vadd.f32 1.0, %v1299_v61  ;;  %v1181_v4 = vld [vmem:[%s2913_s5 + $0x110] sm:$0xff] }
 0x27e   : > { %v1445_v26 = vmul.f32 %v1429_v43, %v1186_v55  ;;  %v1962_v14 = vpop.eup %1961  ;;  %v1325_v59 = vmul.f32 0.6931472, %v1960_v5  ;;  %v1200_v20 = vmax.f32 %v2703_v38, 0.0  ;;  %vm2804_vm1 = vcmp.lt.f32.partialorder %v1302_v15, 0.0004427343 }
 0x27f   : > { %v1460_v46 = vadd.f32 %v1444_v3, %v1153_v62  ;;  %v1322_v47 = vsel %vm2776_vm15, %v1319_v8, %v1316_v2  ;;  %v1305_v27 = vadd.f32 1.0, %v1962_v14  ;;  %v1308_v16 = vmul.f32 -0.5, %v1962_v14  ;;  %v1182_v62 = vld [vmem:[%s2913_s5 + $0x118] sm:$0xff] }
 0x280   : > { %v1461_v10 = vadd.f32 %v1445_v26, %v1154_v1  ;;  %v1331_v11 = vsel %vm2783_vm0, %v1328_v21, %v1325_v59  ;;  %v1426_v13 = vadd.f32 %v1322_v47, %v1202_v12  ;;  %v1301_v30 = vmul.f32 %v1956_v50, %v1300_v25  ;;  %v1149_v50 = vld [vmem:[%s2913_s5 + $0x10] sm:$0xff]  ;;  %v1150_v1 = vld [vmem:[%s2913_s5 + $0x18] sm:$0xff]  ;;  %v1147_v25 = vld [vmem:[%s2913_s5] sm:$0xff] }
 0x281   : > { %v1427_v28 = vadd.f32 %v1331_v11, %v1203_v40  ;;  %1967 = vlog2.f32 %v1305_v27  ;;  %v1309_v24 = vadd.f32 1.0, %v1308_v16  ;;  %v1311_v35 = vand.u32 2147483647, %v1962_v14  ;;  %v1180_v27 = vld [vmem:[%s2913_s5 + $0x108] sm:$0xff]  ;;  %v1131_v16 = vld [vmem:[#allocation2 + $0x30] sm:$0xff] }
 0x282   : > { %v1498_v0 = vpack.c.bf16 %v1461_v10, %v1460_v46  ;;  %v1442_v22 = vmul.f32 %v1426_v13, %v1183_v37  ;;  %1969 = vpow2.f32 %v1248_v19  ;;  %v1964_v34 = vpop.eup %1963  ;;  %v1201_v52 = vmax.f32 %v2714_v56, 0.0 }
 0x283   : > { %v1443_v53 = vmul.f32 %v1427_v28, %v1184_v6  ;;  %v1966_v41 = vpop.eup %1965  ;;  %v1278_v54 = vadd.f32 1.0, %v1964_v34  ;;  %v1281_v51 = vmul.f32 -0.5, %v1964_v34  ;;  %v1310_v29 = vmul.f32 %v1962_v14, %v1309_v24  ;;  %v1179_v14 = vld [vmem:[%s2913_s5 + $0x100] sm:$0xff]  ;;  %v1135_v28 = vld [vmem:[#allocation2 + $0x50] sm:$0xff] }
 0x284   : > { %1510 = vmatpush.bf16.msra.mxu0 %v1498_v0  ;;  %1742 = vmatpush.bf16.msra.mxu1 %v1498_v0  ;;  %v1458_v31 = vadd.f32 %v1442_v22, %v1151_v17  ;;  %v1298_v44 = vmul.f32 0.6931472, %v1966_v41  ;;  %vm2814_vm2 = vcmp.lt.f32.partialorder %v1311_v35, 0.0004427343  ;;  %v1284_v56 = vand.u32 2147483647, %v1964_v34 }
 0x285   : > { %1743 = vmatpush.bf16.msra.mxu2 %v1498_v0  ;;  %1744 = vmatpush.bf16.msra.mxu3 %v1498_v0  ;;  %v1459_v45 = vadd.f32 %v1443_v53, %v1152_v23  ;;  %1971 = vlog2.f32 %v1278_v54  ;;  %v1282_v18 = vadd.f32 1.0, %v1281_v51  ;;  %v1198_v3 = vmax.f32 %v2740_v9, 0.0  ;;  %v1132_v0 = vld [vmem:[#allocation2] sm:$0xff]  ;;  %v1136_v23 = vld [vmem:[#allocation2 + $0x68] sm:$0xff]  ;;  %v1144_v53 = vld [vmem:[#allocation2 + $0x70] sm:$0xff] }
 0x286   : > { %v1304_v32 = vsel %vm2804_vm1, %v1301_v30, %v1298_v44  ;;  %vm1285_vm3 = vcmp.lt.f32.partialorder %v1284_v56, 0.0004427343  ;;  %v1199_v37 = vmax.f32 %v2745_v48, 0.0  ;;  %v1148_v48 = vld [vmem:[%s2913_s5 + $0x8] sm:$0xff]  ;;  %v1139_v22 = vld [vmem:[#allocation2 + $0x40] sm:$0xff]  ;;  %v1487_v30 = vpack.c.bf16 %v1132_v0, %v1131_v16  ;;  %v1134_v54 = vld [vmem:[#allocation2 + $0x18] sm:$0xff] }
 0x287   : > { %v1968_v49 = vpop.eup %1967  ;;  %v1497_v38 = vpack.c.bf16 %v1459_v45, %v1458_v31  ;;  %v1424_v42 = vadd.f32 %v1304_v32, %v1200_v20  ;;  %v1283_v60 = vmul.f32 %v1964_v34, %v1282_v18  ;;  %v1140_v24 = vld [vmem:[#allocation2 + $0x20] sm:$0xff]  ;;  %v1489_v35 = vpack.c.bf16 %v1136_v23, %v1135_v28  ;;  %v1137_v51 = vld [vmem:[#allocation2 + $0x8] sm:$0xff]  ;;  %v1141_v44 = vld [vmem:[#allocation2 + $0x10] sm:$0xff] }
 0x288   : > { %v1970_v55 = vpop.eup %1969  ;;  %v1307_v39 = vmul.f32 0.6931472, %v1968_v49  ;;  %v1143_v34 = vld [vmem:[#allocation2 + $0x60] sm:$0xff]  ;;  %v1491_v41 = vpack.c.bf16 %v1140_v24, %v1139_v22  ;;  %v1138_v45 = vld [vmem:[#allocation2 + $0x48] sm:$0xff] }
 0x289   : > { %1511 = vmatpush.bf16.msra.mxu0 %v1497_v38  ;;  %1745 = vmatpush.bf16.msra.mxu1 %v1497_v38  ;;  %v1287_v57 = vadd.f32 1.0, %v1970_v55  ;;  %v1290_v58 = vmul.f32 -0.5, %v1970_v55  ;;  %v1440_v40 = vmul.f32 %v1424_v42, %v1181_v4  ;;  %v1293_v26 = vand.u32 2147483647, %v1970_v55  ;;  %v1146_v49 = vld [vmem:[#allocation2 + $0x28] sm:$0xff] }
 0x28a   : > { %1746 = vmatpush.bf16.msra.mxu2 %v1497_v38  ;;  %1747 = vmatpush.bf16.msra.mxu3 %v1497_v38  ;;  %v1313_v43 = vsel %vm2814_vm2, %v1310_v29, %v1307_v39  ;;  %v1493_v31 = vpack.c.bf16 %v1144_v53, %v1143_v34  ;;  %v1145_v29 = vld [vmem:[#allocation2 + $0x78] sm:$0xff]  ;;  %v1488_v38 = vpack.c.bf16 %v1134_v54, %v1133_v36  ;;  %v1196_v18 = vld [vmem:[%s2914_s6 + $0x1] sm:$0x1] }
 0x28b   : > { %v1425_v8 = vadd.f32 %v1313_v43, %v1201_v52  ;;  %1973 = vlog2.f32 %v1287_v57  ;;  %v1972_v63 = vpop.eup %1971  ;;  %v1291_v21 = vadd.f32 1.0, %v1290_v58  ;;  %v1456_v61 = vadd.f32 %v1440_v40, %v1149_v50  ;;  %v1142_v52 = vld [vmem:[#allocation2 + $0x38] sm:$0xff] }
 0x28c   : > { %v1280_v5 = vmul.f32 0.6931472, %v1972_v63  ;;  %vm1294_vm4 = vcmp.lt.f32.partialorder %v1293_v26, 0.0004427343  ;;  %v1490_v4 = vpack.c.bf16 %v1138_v45, %v1137_v51  ;;  %v1492_v32 = vpack.c.bf16 %v1142_v52, %v1141_v44 }
 0x28d   : > { %v1441_v33 = vmul.f32 %v1425_v8, %v1182_v62  ;;  %v1292_v46 = vmul.f32 %v1970_v55, %v1291_v21  ;;  %v1494_v12 = vpack.c.bf16 %v1146_v49, %v1145_v29  ;;  %v1471_v55 = vand.u32 2147483647, %v1196_v18 }
 0x28e   : > { %v1286_v7 = vsel %vm1285_vm3, %v1283_v60, %v1280_v5  ;;  %v1470_v60 = vmax.f32 %v1196_v18, 0.0 }
 0x28f   : > { %v1457_v2 = vadd.f32 %v1441_v33, %v1150_v1  ;;  %v1422_v59 = vadd.f32 %v1286_v7, %v1198_v3  ;;  %v1472_v39 = vsub.f32 0.0, %v1471_v55  ;;  %v1197_v3 = vld [vmem:[%s2914_s6 + $0x2] sm:$0x1]  ;;  %v1195_v33 = vld [vmem:[%s2914_s6] sm:$0x1] }
 0x291   : > { %v1974_v19 = vpop.eup %1973  ;;  %v1496_v10 = vpack.c.bf16 %v1457_v2, %v1456_v61  ;;  %v1438_v47 = vmul.f32 %v1422_v59, %v1179_v14  ;;  %v1473_v42 = vmul.f32 1.442695, %v1472_v39 }
 0x292   : > { %v1289_v9 = vmul.f32 0.6931472, %v1974_v19 }
 0x293   : > { %1512 = vmatpush.bf16.msra.mxu0 %v1496_v10  ;;  %1748 = vmatpush.bf16.msra.mxu1 %v1496_v10  ;;  %v1454_v15 = vadd.f32 %v1438_v47, %v1147_v25  ;;  %1975 = vpow2.f32 %v1473_v42 }
 0x294   : > { %1749 = vmatpush.bf16.msra.mxu2 %v1496_v10  ;;  %1750 = vmatpush.bf16.msra.mxu3 %v1496_v10  ;;  %v1295_v6 = vsel %vm1294_vm4, %v1292_v46, %v1289_v9 }
 0x295   : > { %v1423_v11 = vadd.f32 %v1295_v6, %v1199_v37 }
 0x297   : > { %v1439_v13 = vmul.f32 %v1423_v11, %v1180_v27 }
 0x299   : > { %v1455_v17 = vadd.f32 %v1439_v13, %v1148_v48  ;;  %v1976_v56 = vpop.eup %1975 }
 0x29a   : > { %v1475_v57 = vadd.f32 1.0, %v1976_v56  ;;  %v1478_v58 = vmul.f32 -0.5, %v1976_v56  ;;  %v1481_v43 = vand.u32 2147483647, %v1976_v56 }
 0x29b   : > { %v1495_v20 = vpack.c.bf16 %v1455_v17, %v1454_v15 }
 0x29c   : > { %1977 = vlog2.f32 %v1475_v57  ;;  %v1479_v50 = vadd.f32 1.0, %v1478_v58  ;;  %vm1482_vm5 = vcmp.lt.f32.partialorder %v1481_v43, 0.0004427343 }
 0x29d   : > { %1513 = vmatpush.bf16.msra.mxu0 %v1495_v20  ;;  %1751 = vmatpush.bf16.msra.mxu1 %v1495_v20 }
 0x29e   : > { %1752 = vmatpush.bf16.msra.mxu2 %v1495_v20  ;;  %1753 = vmatpush.bf16.msra.mxu3 %v1495_v20  ;;  %v1480_v8 = vmul.f32 %v1976_v56, %v1479_v50 }
 0x2a0   : > { %1514 = vmatmul.bf16.vlgmr.msra.gmra.mxu0 %v1487_v30  ;;  %1524 = vmatmul.bf16.vlgmr.msra.gmra.mxu1 %v1489_v35 }
 0x2a1   : > { %1534 = vmatmul.bf16.vlgmr.msra.gmra.mxu2 %v1491_v41  ;;  %1544 = vmatmul.bf16.vlgmr.msra.gmra.mxu3 %v1493_v31 }
 0x2a2   : > { %v1978_v62 = vpop.eup %1977 }
 0x2a3   : > { %v1477_v40 = vmul.f32 0.6931472, %v1978_v62 }
 0x2a5   : > { %v1483_v63 = vsel %vm1482_vm5, %v1480_v8, %v1477_v40 }
 0x2a6   : > { %v1484_v1 = vadd.f32 %v1483_v63, %v1470_v60 }
 0x2a8   : > { %v1485_v21 = vmul.f32 %v1484_v1, %v1197_v3 }
 0x2aa   : > { %v1486_v61 = vadd.f32 %v1485_v21, %v1195_v33 }
 0x2ac   : > { %v1504_v5 = vperm.slane %v1486_v61, 0 }
 0x2b0   : > { %1519 = vmatmul.bf16.gmra.mxu0 %v1488_v38  ;;  %1529 = vmatmul.bf16.gmra.mxu1 %v1490_v4 }
 0x2b1   : > { %1539 = vmatmul.bf16.gmra.mxu2 %v1492_v32  ;;  %1549 = vmatmul.bf16.gmra.mxu3 %v1494_v12 }
 0x31d   : > { %v1515_v26 = vpop.f32.mrf.mxu0  ;;  %v1525_v2 = vpop.f32.mrf.mxu1 }
 0x31e   : > { %v1516_v7 = vadd.f32 %v1515_v26, %v1504_v5  ;;  %v1526_v14 = vadd.f32 %v1525_v2, %v1504_v5 }
 0x320   : > { %1556 = vst.msk [vmem:[%s2210_s28] sm:$0xff] %vm1555_vm6, %v1516_v7 }
 0x321   : > { %1560 = vst.msk [vmem:[%s2210_s28 + $0x20] sm:$0xff] %vm1555_vm6, %v1526_v14 }
 0x324   : > { %v1535_v46 = vpop.f32.mrf.mxu2  ;;  %v1545_v59 = vpop.f32.mrf.mxu3 }
 0x325   : > { %v1536_v19 = vadd.f32 %v1535_v46, %v1504_v5  ;;  %v1546_v10 = vadd.f32 %v1545_v59, %v1504_v5  ;;  %v1517_v37 = vpop.f32.mrf.mxu0  ;;  %v1527_v9 = vpop.f32.mrf.mxu1 }
 0x326   : > { %v1518_v47 = vadd.f32 %v1517_v37, %v1504_v5  ;;  %v1528_v25 = vadd.f32 %v1527_v9, %v1504_v5 }
 0x327   : > { %1564 = vst.msk [vmem:[%s2210_s28 + $0x40] sm:$0xff] %vm1555_vm6, %v1536_v19 }
 0x328   : > { %1568 = vst.msk [vmem:[%s2210_s28 + $0x60] sm:$0xff] %vm1555_vm6, %v1546_v10 }
 0x329   : > { %1557 = vst.msk [vmem:[%s2210_s28 + $0x8] sm:$0xff] %vm1555_vm6, %v1518_v47 }
 0x32a   : > { %1561 = vst.msk [vmem:[%s2210_s28 + $0x28] sm:$0xff] %vm1555_vm6, %v1528_v25 }
 0x32c   : > { %v1537_v27 = vpop.f32.mrf.mxu2  ;;  %v1547_v6 = vpop.f32.mrf.mxu3 }
 0x32d   : > { %v1538_v11 = vadd.f32 %v1537_v27, %v1504_v5  ;;  %v1548_v48 = vadd.f32 %v1547_v6, %v1504_v5  ;;  %v1520_v13 = vpop.f32.mrf.mxu0  ;;  %v1530_v15 = vpop.f32.mrf.mxu1 }
 0x32e   : > { %v1521_v16 = vadd.f32 %v1520_v13, %v1504_v5  ;;  %v1531_v0 = vadd.f32 %v1530_v15, %v1504_v5 }
 0x32f   : > { %1565 = vst.msk [vmem:[%s2210_s28 + $0x48] sm:$0xff] %vm1555_vm6, %v1538_v11 }
 0x330   : > { %1569 = vst.msk [vmem:[%s2210_s28 + $0x68] sm:$0xff] %vm1555_vm6, %v1548_v48 }
 0x331   : > { %1558 = vst.msk [vmem:[%s2210_s28 + $0x10] sm:$0xff] %vm1555_vm6, %v1521_v16 }
 0x332   : > { %1562 = vst.msk [vmem:[%s2210_s28 + $0x30] sm:$0xff] %vm1555_vm6, %v1531_v0 }
 0x334   : > { %v1540_v17 = vpop.f32.mrf.mxu2  ;;  %v1550_v28 = vpop.f32.mrf.mxu3 }
 0x335   : > { %v1541_v23 = vadd.f32 %v1540_v17, %v1504_v5  ;;  %v1551_v22 = vadd.f32 %v1550_v28, %v1504_v5  ;;  %v1522_v24 = vpop.f32.mrf.mxu0  ;;  %v1532_v34 = vpop.f32.mrf.mxu1 }
 0x336   : > { %v1523_v53 = vadd.f32 %v1522_v24, %v1504_v5  ;;  %v1533_v20 = vadd.f32 %v1532_v34, %v1504_v5 }
 0x337   : > { %1566 = vst.msk [vmem:[%s2210_s28 + $0x50] sm:$0xff] %vm1555_vm6, %v1541_v23 }
 0x338   : > { %1570 = vst.msk [vmem:[%s2210_s28 + $0x70] sm:$0xff] %vm1555_vm6, %v1551_v22 }
 0x339   : > { %1559 = vst.msk [vmem:[%s2210_s28 + $0x18] sm:$0xff] %vm1555_vm6, %v1523_v53 }
 0x33a   : > { %1563 = vst.msk [vmem:[%s2210_s28 + $0x38] sm:$0xff] %vm1555_vm6, %v1533_v20 }
 0x33c   : > { %v1542_v30 = vpop.f32.mrf.mxu2  ;;  %v1552_v35 = vpop.f32.mrf.mxu3 }
 0x33d   : > { %v1543_v41 = vadd.f32 %v1542_v30, %v1504_v5  ;;  %v1553_v31 = vadd.f32 %v1552_v35, %v1504_v5 }
 0x33f   : > { %1567 = vst.msk [vmem:[%s2210_s28 + $0x58] sm:$0xff] %vm1555_vm6, %v1543_v41 }
 0x340   : > { %1571 = vst.msk [vmem:[%s2210_s28 + $0x78] sm:$0xff] %vm1555_vm6, %v1553_v31 }
 0x341 PF: > { %s20_s8 = sadd.s32 1, %s2075_s8   ;;  %s2978_s28 = sld [smem:[#allocation7_spill]] }
 0x342   : > { %p17_p8 = scmp.ge.s32.totalorder %s20_s8, 10   ;;  %s2979_s19 = sld [smem:[#allocation8_spill]] }
 0x343   : > { %s2980_s30 = sld [smem:[#allocation9_spill]]  ;;  %s2981_s24 = smov %s2051_s25 }
 0x344   : > { %s2982_s25 = smov %s2055_s26  ;;  %s2983_s26 = smov %s2173_s14 }
 0x345   : > { %s2984_s27 = smov %s2067_s29  ;;  %19 = sbr.rel (!%p17_p8) target bundleno = 5 (0x5), region = 114 }
 0x348   : > { %s2985_s29 = smov %s2979_s19 }
 0x34a   :  { %1594 = vsyncpa [#allocation5], 1 }
 0x34b   :  { %1596 = vsyncpa [#allocation5 + $0x1], 1 }

</bundles_post_ra>
